<compile_context>
chip_gen: v6e
topology: v6e:2x2x1
jax: 0.10.0
libtpu: 0.0.40
codegen_flags: <defaults>
</compile_context>

<pallas_src>
import numpy as np
import jax
import jax.numpy as jnp
from jax.experimental import pallas as pl
from jax.experimental.pallas import tpu as pltpu


def _round_up(x, m):
    return (x + m - 1) // m * m


# ---------------------------------------------------------------------------
# Kernel.  Per grid step (bi, si):
#   every step : masked token mean over L  +  ragged dialogue mean accumulated in f32 scratch
#   last step  : fused text_projector/Q proj -> fused K|V proj -> q_len==1 multi-head
#                cross attention -> output proj -> classification head -> lane-dense logits
# ---------------------------------------------------------------------------
def _fused_forward_kernel(tile_ids_ref,                                   # scalar prefetch (SMEM)
                          maskn_ref, text_ref, pool_ref, frames_ref,
                          w_hb_ref, w_qp_ref, b_qp_ref, w_kv_ref, b_kv_ref,
                          w_o_ref, b_o_ref, w1_ref, b1_ref, w2_ref, b2_ref,
                          out_ref, tq_ref):
    del tile_ids_ref                                   # only used by the index_maps
    f32 = jnp.float32
    si = pl.program_id(1)
    n_si = pl.num_programs(1)

    @pl.when(si == 0)
    def _init():
        tq_ref[...] = jnp.zeros_like(tq_ref)

    # --- phase 1 (every step): masked token mean (elementwise, no inflated matmul) +
    #     ragged dialogue mean via a small exact-f32 (B_TILE, TS) matmul.
    sent = jnp.sum(text_ref[...].astype(f32) * maskn_ref[...], axis=1)            # (TS, Dt)
    tq_ref[...] += jnp.dot(pool_ref[0, 0], sent, preferred_element_type=f32)      # (B_TILE, Dt)

    # --- phase 2 (last step for this batch tile): projections, attention, head.
    @pl.when(si == n_si - 1)
    def _finalize():
        b_tile = tq_ref.shape[0]
        dv = w_o_ref.shape[0]
        fb = frames_ref.shape[0]
        f = fb // b_tile

        def mm(x, w_ref):
            # cast the activation to the weight dtype (bf16 on all generations by default),
            # always accumulate in f32 on the MXU.
            return jnp.dot(x.astype(w_ref.dtype), w_ref[...], preferred_element_type=f32)

        # fused text_projector + (pre-scaled) Q projection
        q = mm(tq_ref[...], w_qp_ref) + b_qp_ref[...]                             # (B_TILE, Dv)
        # fused K|V projection of frame CLS tokens (batch-major rows: row = b*F + f)
        kv = mm(frames_ref[...], w_kv_ref) + b_kv_ref[...]                        # (B_TILE*F, 2Dv)
        k = kv[:, :dv].reshape(b_tile, f, dv)
        v = kv[:, dv:].reshape(b_tile, f, dv)

        # multi-head attention with a single query per dialogue:
        # one block-diagonal-ones matmul reduces q*k over each head's hd lanes AND
        # broadcasts the per-head score back across those lanes (full-width N=Dv MXU op).
        qk = q[:, None, :] * k                                                    # (B_TILE, F, Dv)
        scores = mm(qk.reshape(fb, dv), w_hb_ref).reshape(b_tile, f, dv)
        m = jnp.max(scores, axis=1, keepdims=True)                                # (B_TILE, 1, Dv)
        e = jnp.exp(scores - m)
        denom = jnp.sum(e, axis=1, keepdims=True)
        # approx reciprocal (EUP slot): ~1e-3 rel. error; use approx=False for exact parity.
        p = e * pl.reciprocal(denom, approx=True)
        attn = jnp.sum(p * v, axis=1)                                             # (B_TILE, Dv)

        # MHA output projection + classification head (Dropout = identity in eval).
        ca = mm(attn, w_o_ref) + b_o_ref[...]
        h1 = jnp.maximum(mm(ca, w1_ref) + b1_ref[...], 0.0)
        logits = mm(h1, w2_ref) + b2_ref[...]                                     # (B_TILE, Cp)
        out_ref[...] = logits.astype(out_ref.dtype)


# ---------------------------------------------------------------------------
# One-time weight fusion (offline): projector->Q fusion, K|V concat, lane-dense logits,
# head-broadcast (block-diagonal ones) matrix.
# ---------------------------------------------------------------------------
def fuse_head_params(params, num_heads, *, matmul_dtype=jnp.bfloat16):
    Dt, Dv = params["w_proj"].shape
    H1 = params["w1"].shape[1]
    C = params["w2"].shape[1]
    hd = Dv // num_heads
    scale = 1.0 / float(hd) ** 0.5
    Cp = _round_up(C, 128)                              # lane-dense logits width

    w_qp = (params["w_proj"] @ params["w_q"]) * scale                       # (Dt, Dv)
    b_qp = (params["b_proj"] @ params["w_q"] + params["b_q"]) * scale       # (1, Dv)
    w_kv = jnp.concatenate([params["w_k"], params["w_v"]], axis=1)          # (Dv, 2Dv)
    b_kv = jnp.concatenate([params["b_k"], params["b_v"]], axis=1)          # (1, 2Dv)
    w2p = jnp.zeros((H1, Cp), jnp.float32).at[:, :C].set(params["w2"])
    b2p = jnp.zeros((1, Cp), jnp.float32).at[:, :C].set(params["b2"])

    # head-broadcast matrix: block-diagonal ones (exact 0/1 even in bf16)
    hb = np.kron(np.eye(num_heads, dtype=np.float32), np.ones((hd, hd), np.float32))  # (Dv, Dv)

    md = matmul_dtype
    return dict(
        w_hb=jnp.asarray(hb, md),
        w_qp=w_qp.astype(md), b_qp=b_qp.astype(jnp.float32),
        w_kv=w_kv.astype(md), b_kv=b_kv.astype(jnp.float32),
        w_o=params["w_o"].astype(md), b_o=params["b_o"].astype(jnp.float32),
        w1=params["w1"].astype(md), b1=params["b1"].astype(jnp.float32),
        w2=w2p.astype(md), b2=b2p,
        num_heads=num_heads, n_classes=C, matmul_dtype=md,
    )


# ---------------------------------------------------------------------------
# Forward wrapper: metadata-scale glue + one pipelined pallas_call.
# ---------------------------------------------------------------------------
def cross_attention_model_forward(text_hidden, attention_mask, vision_hidden,
                                  lengths, fused, *, sent_tile=64, batch_tile=8):
    S, L, Dt = text_hidden.shape
    B = len(lengths)
    Dv = fused["w_o"].shape[0]
    H1 = fused["w1"].shape[1]
    C = fused["n_classes"]
    Cp = fused["w2"].shape[1]
    F = vision_hidden.shape[0] // B

    # ---- batch / sentence tiling (B padded to a sublane multiple of 8) ----
    B_TILE = max(8, _round_up(batch_tile, 8))
    n_btiles = -(-B // B_TILE)
    B_pad = n_btiles * B_TILE
    TS = _round_up(min(sent_tile, max(S, 1)), 8)
    S_pad = _round_up(S, TS)

    # ---- metadata-scale glue (numpy; no large tensor is touched here) ----
    lens = np.maximum(np.asarray(lengths, np.int64), 0)
    offs = np.concatenate([[0], np.cumsum(lens)])
    dlg_of_sent = np.repeat(np.arange(B), lens)                                    # (S,)

    first_tile = np.zeros(n_btiles, np.int64)
    n_steps = np.zeros(n_btiles, np.int64)
    for bi in range(n_btiles):
        lo, hi = bi * B_TILE, min((bi + 1) * B_TILE, B)
        s_lo, s_hi = int(offs[lo]), int(offs[hi])
        if s_hi > s_lo:
            first_tile[bi] = s_lo // TS
            n_steps[bi] = (s_hi - 1) // TS - first_tile[bi] + 1
    n_stiles = int(max(1, n_steps.max()))

    # per-(batch-tile, step) sentence-tile ids; padding steps re-use an in-bounds tile
    # with zero pooling weights (each real sentence is counted exactly once).
    sidx = np.arange(n_stiles)
    tile_ids = (first_tile[:, None]
                + np.minimum(sidx[None, :], np.maximum(n_steps[:, None] - 1, 0))).astype(np.int32)
    sent_glob = tile_ids.astype(np.int64)[:, :, None] * TS + np.arange(TS)[None, None, :]
    step_ok = sidx[None, :, None] < n_steps[:, None, None]
    in_rng = (sent_glob < S) & step_ok
    d = dlg_of_sent[np.clip(sent_glob, 0, max(S - 1, 0))]
    local = d - np.arange(n_btiles)[:, None, None] * B_TILE
    sel = in_rng & (local >= 0) & (local < B_TILE)
    pool = np.zeros((n_btiles, n_stiles, B_TILE, TS), np.float32)      # exact f32 pooling weights
    bi_i, si_i, tl_i = np.nonzero(sel)
    pool[bi_i, si_i, local[bi_i, si_i, tl_i], tl_i] = 1.0 / np.maximum(lens[d[bi_i, si_i, tl_i]], 1)

    # normalized token mask (f32, exact ragged token means); tiny (S, L) tensor
    mask = attention_mask.astype(jnp.float32)
    maskn = mask / jnp.maximum(jnp.sum(mask, axis=1, keepdims=True), 1e-9)
    maskn = jnp.pad(maskn, ((0, S_pad - S), (0, 0)))[:, :, None]                   # (S_pad, L, 1)

    # text: padded along S only when S % TS != 0 (one extra HBM pass in that case only)
    text_p = text_hidden if S_pad == S else jnp.pad(text_hidden, ((0, S_pad - S), (0, 0), (0, 0)))

    # frame CLS tokens: output-sized strided slice, kept batch-major (row = b*F + f)
    # TODO(synk): move the CLS selection into the frames BlockSpec (token dim squeezed)
    #             to avoid even this output-sized gather.
    frames_cls = vision_hidden[:, 0, :]                                            # (B*F, Dv)
    if B_pad != B:
        frames_cls = jnp.pad(frames_cls, ((0, (B_pad - B) * F), (0, 0)))

    # ---- explicit VMEM budget: double-buffered streamed blocks + weights + scratch ----
    tile_bytes = (TS * L * Dt * text_p.dtype.itemsize + TS * L * 4 + B_TILE * TS * 4
                  + B_TILE * F * Dv * frames_cls.dtype.itemsize + B_TILE * Cp * 4)
    w_bytes = sum(int(np.prod(fused[k].shape)) * fused[k].dtype.itemsize
                  for k in ("w_hb", "w_qp", "b_qp", "w_kv", "b_kv",
                            "w_o", "b_o", "w1", "b1", "w2", "b2"))
    vmem_bytes = int(min(128 << 20, 2 * (tile_bytes + w_bytes) + B_TILE * Dt * 4 + (8 << 20)))

    grid_spec = pltpu.PrefetchScalarGridSpec(
        num_scalar_prefetch=1,
        grid=(int(n_btiles), int(n_stiles)),
        in_specs=[
            pl.BlockSpec((TS, L, 1), lambda bi, si, tid: (tid[bi, si], 0, 0)),      # maskn
            pl.BlockSpec((TS, L, Dt), lambda bi, si, tid: (tid[bi, si], 0, 0)),     # text (streamed)
            pl.BlockSpec((1, 1, B_TILE, TS), lambda bi, si, tid: (bi, si, 0, 0)),   # pool weights
            pl.BlockSpec((B_TILE * F, Dv), lambda bi, si, tid: (bi, 0)),            # frame CLS
            # weights / biases: constant index maps -> DMA'd once, never re-fetched.
            # TODO(synk): single-buffer these (pipeline_mode=pl.Buffered(1)) once verified.
            pl.BlockSpec((Dv, Dv), lambda bi, si, tid: (0, 0)),                     # w_hb
            pl.BlockSpec((Dt, Dv), lambda bi, si, tid: (0, 0)),                     # w_qp
            pl.BlockSpec((1, Dv), lambda bi, si, tid: (0, 0)),                      # b_qp
            pl.BlockSpec((Dv, 2 * Dv), lambda bi, si, tid: (0, 0)),                 # w_kv
            pl.BlockSpec((1, 2 * Dv), lambda bi, si, tid: (0, 0)),                  # b_kv
            pl.BlockSpec((Dv, Dv), lambda bi, si, tid: (0, 0)),                     # w_o
            pl.BlockSpec((1, Dv), lambda bi, si, tid: (0, 0)),                      # b_o
            pl.BlockSpec((Dv, H1), lambda bi, si, tid: (0, 0)),                     # w1
            pl.BlockSpec((1, H1), lambda bi, si, tid: (0, 0)),                      # b1
            pl.BlockSpec((H1, Cp), lambda bi, si, tid: (0, 0)),                     # w2
            pl.BlockSpec((1, Cp), lambda bi, si, tid: (0, 0)),                      # b2
        ],
        out_specs=pl.BlockSpec((B_TILE, Cp), lambda bi, si, tid: (bi, 0)),
        scratch_shapes=[pltpu.VMEM((B_TILE, Dt), jnp.float32)],
    )

    out = pl.pallas_call(
        _fused_forward_kernel,
        out_shape=jax.ShapeDtypeStruct((B_pad, Cp), jnp.float32),
        grid_spec=grid_spec,
        compiler_params=pltpu.CompilerParams(
            dimension_semantics=("parallel", "arbitrary"),   # batch tiles across v7x cores
            vmem_limit_bytes=vmem_bytes),
    )(jnp.asarray(tile_ids), maskn, text_p, jnp.asarray(pool), frames_cls,
      fused["w_hb"], fused["w_qp"], fused["b_qp"], fused["w_kv"], fused["b_kv"],
      fused["w_o"], fused["b_o"], fused["w1"], fused["b1"], fused["w2"], fused["b2"])
    return out[:B, :C]


# ---------------------------------------------------------------------------
# Pure-JAX reference (same math, ragged-length aware) for a sanity check
# ---------------------------------------------------------------------------
def reference_forward(text_hidden, attention_mask, vision_hidden, lengths, params, num_heads):
    S, L, Dt = text_hidden.shape
    B = len(lengths)
    Dv = params["w_q"].shape[0]
    m = attention_mask.astype(jnp.float32)
    pooled = (text_hidden * m[:, :, None]).sum(1) / jnp.maximum(m.sum(1, keepdims=True), 1e-9)
    segs, start = [], 0
    for ln in lengths:                       # ragged per-dialogue mean
        segs.append(pooled[start:start + ln].mean(axis=0))
        start += ln
    seg = jnp.stack(segs)                                                        # (B, Dt)
    frames_cls = vision_hidden[:, 0, :].reshape(B, -1, Dv)
    hd = Dv // num_heads
    q_in = seg @ params["w_proj"] + params["b_proj"][0]
    q = (q_in @ params["w_q"] + params["b_q"][0]) / jnp.sqrt(float(hd))
    k = frames_cls @ params["w_k"] + params["b_k"][0]
    v = frames_cls @ params["w_v"] + params["b_v"][0]
    outs = []
    for h in range(num_heads):
        qs = q[:, h * hd:(h + 1) * hd]
        ks = k[:, :, h * hd:(h + 1) * hd]
        vs = v[:, :, h * hd:(h + 1) * hd]
        scores = jnp.einsum("bd,bfd->bf", qs, ks)
        p = jax.nn.softmax(scores, axis=-1)
        outs.append(jnp.einsum("bf,bfd->bd", p, vs))
    attn = jnp.concatenate(outs, axis=-1)
    ca = attn @ params["w_o"] + params["b_o"][0]
    h1 = jnp.maximum(ca @ params["w1"] + params["b1"][0], 0.0)
    return h1 @ params["w2"] + params["b2"][0]


def init_params(key, Dt, Dv, H1, C):
    keys = jax.random.split(key, 14)
    s = 0.05

    def w(k, shape):
        return jax.random.normal(k, shape, jnp.float32) * s

    return dict(
        w_proj=w(keys[0], (Dt, Dv)), b_proj=w(keys[1], (1, Dv)),
        w_q=w(keys[2], (Dv, Dv)), b_q=w(keys[3], (1, Dv)),
        w_k=w(keys[4], (Dv, Dv)), b_k=w(keys[5], (1, Dv)),
        w_v=w(keys[6], (Dv, Dv)), b_v=w(keys[7], (1, Dv)),
        w_o=w(keys[8], (Dv, Dv)), b_o=w(keys[9], (1, Dv)),
        w1=w(keys[10], (Dv, H1)), b1=w(keys[11], (1, H1)),
        w2=w(keys[12], (H1, C)), b2=w(keys[13], (1, C)),
    )


if __name__ == "__main__":
    key = jax.random.PRNGKey(0)
    k_text, k_vis, k_par = jax.random.split(key, 3)

    B = 2              # dialogues (batch)
    lengths = [2, 4]   # ragged: sentences per dialogue
    S = sum(lengths)
    L = 8              # text tokens per sentence
    Dt = 32            # synthetic CLIP text hidden size
    F = 4              # frames per dialogue
    T = 8              # vision tokens per frame (CLS at index 0)
    Dv = 64            # synthetic CLIP vision hidden size
    num_heads = 4      # args.num_heads_ca
    H1 = 256           # classification head hidden
    C = 5              # args.label_number

    text_hidden = jax.random.normal(k_text, (S, L, Dt), jnp.float32)
    tok_idx = jnp.arange(L)[None, :]
    valid_len = 4 + (jnp.arange(S)[:, None] % 4)
    attention_mask = (tok_idx < valid_len).astype(jnp.float32)          # (S, L)
    vision_hidden = jax.random.normal(k_vis, (B * F, T, Dv), jnp.float32)

    params = init_params(k_par, Dt, Dv, H1, C)
    ref = reference_forward(text_hidden, attention_mask, vision_hidden,
                            lengths, params, num_heads)

    # f32 matmul path (highest-precision parity check)
    fused_f32 = fuse_head_params(params, num_heads, matmul_dtype=jnp.float32)
    out = jax.block_until_ready(
        cross_attention_model_forward(text_hidden, attention_mask, vision_hidden,
                                      lengths, fused_f32))
    assert out.shape == (B, C), out.shape
    assert jnp.allclose(out, ref, atol=3e-3, rtol=2e-2), (out, ref)

    # bf16 matmul-operand path (default; all TPU generations): f32 MXU accumulation,
    # f32 softmax/ReLU/pooling.
    fused_bf16 = fuse_head_params(params, num_heads, matmul_dtype=jnp.bfloat16)
    out_bf16 = jax.block_until_ready(
        cross_attention_model_forward(text_hidden, attention_mask, vision_hidden,
                                      lengths, fused_bf16))
    assert out_bf16.shape == (B, C), out_bf16.shape
    assert jnp.allclose(out_bf16, ref, atol=6e-2, rtol=1e-1), (out_bf16, ref)

    print("KERNEL_OK")
</pallas_src>

<mosaic_0001>
module attributes {stable_mosaic.version = 11 : i64} {
  func.func @_fused_forward_kernel(%arg0: i32, %arg1: i32, %arg2: memref<1x1xi32, #tpu.memory_space<smem>>, %arg3: memref<8x8x1xf32, #tpu.memory_space<vmem>>, %arg4: memref<8x8x32xf32, #tpu.memory_space<vmem>>, %arg5: memref<1x1x8x8xf32, #tpu.memory_space<vmem>>, %arg6: memref<32x64xf32, #tpu.memory_space<vmem>>, %arg7: memref<64x64xf32, #tpu.memory_space<vmem>>, %arg8: memref<32x64xf32, #tpu.memory_space<vmem>>, %arg9: memref<1x64xf32, #tpu.memory_space<vmem>>, %arg10: memref<64x128xf32, #tpu.memory_space<vmem>>, %arg11: memref<1x128xf32, #tpu.memory_space<vmem>>, %arg12: memref<64x64xf32, #tpu.memory_space<vmem>>, %arg13: memref<1x64xf32, #tpu.memory_space<vmem>>, %arg14: memref<64x256xf32, #tpu.memory_space<vmem>>, %arg15: memref<1x256xf32, #tpu.memory_space<vmem>>, %arg16: memref<256x128xf32, #tpu.memory_space<vmem>>, %arg17: memref<1x128xf32, #tpu.memory_space<vmem>>, %arg18: memref<8x128xf32, #tpu.memory_space<vmem>>, %arg19: memref<8x32xf32, #tpu.memory_space<vmem>>) attributes {dimension_semantics = [#tpu.dimension_semantics<parallel>, #tpu.dimension_semantics<arbitrary>], iteration_bounds = array<i64: 1, 1>, scalar_prefetch = 1 : i64, scratch_operands = 1 : i64, tpu.core_type = #tpu.core_type<tc>, window_params = [{transform_indices = @transform_0, window_bounds = array<i64: 8, 8, 1>}, {transform_indices = @transform_1, window_bounds = array<i64: 8, 8, 32>}, {transform_indices = @transform_2, window_bounds = array<i64: 1, 1, 8, 8>}, {transform_indices = @transform_3, window_bounds = array<i64: 32, 64>}, {pipeline_mode = #tpu.pipeline_mode<synchronous>, transform_indices = @transform_4, window_bounds = array<i64: 64, 64>}, {pipeline_mode = #tpu.pipeline_mode<synchronous>, transform_indices = @transform_5, window_bounds = array<i64: 32, 64>}, {pipeline_mode = #tpu.pipeline_mode<synchronous>, transform_indices = @transform_6, window_bounds = array<i64: 1, 64>}, {pipeline_mode = #tpu.pipeline_mode<synchronous>, transform_indices = @transform_7, window_bounds = array<i64: 64, 128>}, {pipeline_mode = #tpu.pipeline_mode<synchronous>, transform_indices = @transform_8, window_bounds = array<i64: 1, 128>}, {pipeline_mode = #tpu.pipeline_mode<synchronous>, transform_indices = @transform_9, window_bounds = array<i64: 64, 64>}, {pipeline_mode = #tpu.pipeline_mode<synchronous>, transform_indices = @transform_10, window_bounds = array<i64: 1, 64>}, {pipeline_mode = #tpu.pipeline_mode<synchronous>, transform_indices = @transform_11, window_bounds = array<i64: 64, 256>}, {pipeline_mode = #tpu.pipeline_mode<synchronous>, transform_indices = @transform_12, window_bounds = array<i64: 1, 256>}, {pipeline_mode = #tpu.pipeline_mode<synchronous>, transform_indices = @transform_13, window_bounds = array<i64: 256, 128>}, {pipeline_mode = #tpu.pipeline_mode<synchronous>, transform_indices = @transform_14, window_bounds = array<i64: 1, 128>}, {transform_indices = @transform_15, window_bounds = array<i64: 8, 128>}]} {
    %c0_i32 = arith.constant 0 : i32
    %0 = arith.cmpi eq, %arg1, %c0_i32 : i32
    %1 = arith.extui %0 : i1 to i32
    %c0_i32_0 = arith.constant 0 : i32
    %2 = arith.cmpi ne, %1, %c0_i32_0 : i32
    scf.if %2 {
      %cst_17 = arith.constant 0.000000e+00 : f32
      %17 = vector.broadcast %cst_17 : f32 to vector<8x32xf32>
      %c0_18 = arith.constant 0 : index
      %c0_19 = arith.constant 0 : index
      %18 = vector.load %arg19[%c0_18, %c0_19] : memref<8x32xf32, #tpu.memory_space<vmem>>, vector<8x32xf32>
      tpu.vector_store %arg19[%c0_18, %c0_19], %17 {strides = array<i32>} : memref<8x32xf32, #tpu.memory_space<vmem>>, vector<8x32xf32>,
    } else {
    }
    %c0 = arith.constant 0 : index
    %c0_1 = arith.constant 0 : index
    %c0_2 = arith.constant 0 : index
    %3 = vector.load %arg4[%c0, %c0_1, %c0_2] : memref<8x8x32xf32, #tpu.memory_space<vmem>>, vector<8x8x32xf32>
    %c0_3 = arith.constant 0 : index
    %c0_4 = arith.constant 0 : index
    %c0_5 = arith.constant 0 : index
    %4 = vector.load %arg3[%c0_3, %c0_4, %c0_5] : memref<8x8x1xf32, #tpu.memory_space<vmem>>, vector<8x8x1xf32>
    %5 = vector.broadcast %4 : vector<8x8x1xf32> to vector<8x8x32xf32>
    %6 = arith.mulf %3, %5 : vector<8x8x32xf32>
    %cst = arith.constant dense<0.000000e+00> : vector<8x32xf32>
    %7 = vector.multi_reduction <add>, %6, %cst [1] : vector<8x8x32xf32> to vector<8x32xf32>
    %c0_6 = arith.constant 0 : index
    %c0_7 = arith.constant 0 : index
    %8 = vector.load %arg19[%c0_6, %c0_7] : memref<8x32xf32, #tpu.memory_space<vmem>>, vector<8x32xf32>
    %c0_8 = arith.constant 0 : index
    %c0_9 = arith.constant 0 : index
    %c0_10 = arith.constant 0 : index
    %c0_11 = arith.constant 0 : index
    %9 = vector.load %arg5[%c0_8, %c0_9, %c0_10, %c0_11] : memref<1x1x8x8xf32, #tpu.memory_space<vmem>>, vector<1x1x8x8xf32>
    %10 = vector.shape_cast %9 : vector<1x1x8x8xf32> to vector<8x8xf32>
    %cst_12 = arith.constant dense<0.000000e+00> : vector<8x32xf32>
    %11 = tpu.matmul %10, %7, %cst_12 {dimension_numbers = #tpu.dot_dimension_numbers<[1], [0], [0], [1], [0, 0, 1, 1], [], []>} : vector<8x8xf32>, vector<8x32xf32>, vector<8x32xf32> -> vector<8x32xf32>
    %12 = arith.addf %8, %11 : vector<8x32xf32>
    %c0_13 = arith.constant 0 : index
    %c0_14 = arith.constant 0 : index
    %13 = vector.load %arg19[%c0_13, %c0_14] : memref<8x32xf32, #tpu.memory_space<vmem>>, vector<8x32xf32>
    tpu.vector_store %arg19[%c0_13, %c0_14], %12 {strides = array<i32>} : memref<8x32xf32, #tpu.memory_space<vmem>>, vector<8x32xf32>,
    %c0_i32_15 = arith.constant 0 : i32
    %14 = arith.cmpi eq, %arg1, %c0_i32_15 : i32
    %15 = arith.extui %14 : i1 to i32
    %c0_i32_16 = arith.constant 0 : i32
    %16 = arith.cmpi ne, %15, %c0_i32_16 : i32
    scf.if %16 {
      %c0_17 = arith.constant 0 : index
      %c0_18 = arith.constant 0 : index
      %17 = vector.load %arg19[%c0_17, %c0_18] : memref<8x32xf32, #tpu.memory_space<vmem>>, vector<8x32xf32>
      %c0_19 = arith.constant 0 : index
      %c0_20 = arith.constant 0 : index
      %18 = vector.load %arg8[%c0_19, %c0_20] : memref<32x64xf32, #tpu.memory_space<vmem>>, vector<32x64xf32>
      %cst_21 = arith.constant dense<0.000000e+00> : vector<8x64xf32>
      %19 = tpu.matmul %17, %18, %cst_21 {dimension_numbers = #tpu.dot_dimension_numbers<[1], [0], [0], [1], [0, 0, 1, 1], [], []>} : vector<8x32xf32>, vector<32x64xf32>, vector<8x64xf32> -> vector<8x64xf32>
      %c0_22 = arith.constant 0 : index
      %c0_23 = arith.constant 0 : index
      %20 = vector.load %arg9[%c0_22, %c0_23] : memref<1x64xf32, #tpu.memory_space<vmem>>, vector<1x64xf32>
      %21 = vector.broadcast %20 : vector<1x64xf32> to vector<8x64xf32>
      %22 = arith.addf %19, %21 : vector<8x64xf32>
      %c0_24 = arith.constant 0 : index
      %c0_25 = arith.constant 0 : index
      %23 = vector.load %arg6[%c0_24, %c0_25] : memref<32x64xf32, #tpu.memory_space<vmem>>, vector<32x64xf32>
      %c0_26 = arith.constant 0 : index
      %c0_27 = arith.constant 0 : index
      %24 = vector.load %arg10[%c0_26, %c0_27] : memref<64x128xf32, #tpu.memory_space<vmem>>, vector<64x128xf32>
      %cst_28 = arith.constant dense<0.000000e+00> : vector<32x128xf32>
      %25 = tpu.matmul %23, %24, %cst_28 {dimension_numbers = #tpu.dot_dimension_numbers<[1], [0], [0], [1], [0, 0, 1, 1], [], []>} : vector<32x64xf32>, vector<64x128xf32>, vector<32x128xf32> -> vector<32x128xf32>
      %c0_29 = arith.constant 0 : index
      %c0_30 = arith.constant 0 : index
      %26 = vector.load %arg11[%c0_29, %c0_30] : memref<1x128xf32, #tpu.memory_space<vmem>>, vector<1x128xf32>
      %27 = vector.broadcast %26 : vector<1x128xf32> to vector<32x128xf32>
      %28 = arith.addf %25, %27 : vector<32x128xf32>
      %29 = vector.extract_strided_slice %28 {offsets = [0, 0], sizes = [32, 64], strides = [1, 1]} : vector<32x128xf32> to vector<32x64xf32>
      %30 = vector.shape_cast %29 : vector<32x64xf32> to vector<8x4x64xf32>
      %31 = vector.extract_strided_slice %28 {offsets = [0, 64], sizes = [32, 64], strides = [1, 1]} : vector<32x128xf32> to vector<32x64xf32>
      %32 = vector.shape_cast %31 : vector<32x64xf32> to vector<8x4x64xf32>
      %33 = vector.shape_cast %22 : vector<8x64xf32> to vector<8x1x64xf32>
      %34 = vector.broadcast %33 : vector<8x1x64xf32> to vector<8x4x64xf32>
      %35 = arith.mulf %34, %30 : vector<8x4x64xf32>
      %36 = vector.shape_cast %35 : vector<8x4x64xf32> to vector<32x64xf32>
      %c0_31 = arith.constant 0 : index
      %c0_32 = arith.constant 0 : index
      %37 = vector.load %arg7[%c0_31, %c0_32] : memref<64x64xf32, #tpu.memory_space<vmem>>, vector<64x64xf32>
      %cst_33 = arith.constant dense<0.000000e+00> : vector<32x64xf32>
      %38 = tpu.matmul %36, %37, %cst_33 {dimension_numbers = #tpu.dot_dimension_numbers<[1], [0], [0], [1], [0, 0, 1, 1], [], []>} : vector<32x64xf32>, vector<64x64xf32>, vector<32x64xf32> -> vector<32x64xf32>
      %39 = vector.shape_cast %38 : vector<32x64xf32> to vector<8x4x64xf32>
      %cst_34 = arith.constant dense<0xFF800000> : vector<8x64xf32>
      %40 = vector.multi_reduction <maximumf>, %39, %cst_34 [1] : vector<8x4x64xf32> to vector<8x64xf32>
      %41 = vector.shape_cast %40 : vector<8x64xf32> to vector<8x1x64xf32>
      %42 = vector.broadcast %41 : vector<8x1x64xf32> to vector<8x4x64xf32>
      %43 = arith.subf %39, %42 : vector<8x4x64xf32>
      %44 = math.exp %43 : vector<8x4x64xf32>
      %cst_35 = arith.constant dense<0.000000e+00> : vector<8x64xf32>
      %45 = vector.multi_reduction <add>, %44, %cst_35 [1] : vector<8x4x64xf32> to vector<8x64xf32>
      %46 = vector.shape_cast %45 : vector<8x64xf32> to vector<8x1x64xf32>
      %47 = tpu.reciprocal %46 {approx = true} : vector<8x1x64xf32> -> vector<8x1x64xf32>
      %48 = vector.broadcast %47 : vector<8x1x64xf32> to vector<8x4x64xf32>
      %49 = arith.mulf %44, %48 : vector<8x4x64xf32>
      %50 = arith.mulf %49, %32 : vector<8x4x64xf32>
      %cst_36 = arith.constant dense<0.000000e+00> : vector<8x64xf32>
      %51 = vector.multi_reduction <add>, %50, %cst_36 [1] : vector<8x4x64xf32> to vector<8x64xf32>
      %c0_37 = arith.constant 0 : index
      %c0_38 = arith.constant 0 : index
      %52 = vector.load %arg12[%c0_37, %c0_38] : memref<64x64xf32, #tpu.memory_space<vmem>>, vector<64x64xf32>
      %cst_39 = arith.constant dense<0.000000e+00> : vector<8x64xf32>
      %53 = tpu.matmul %51, %52, %cst_39 {dimension_numbers = #tpu.dot_dimension_numbers<[1], [0], [0], [1], [0, 0, 1, 1], [], []>} : vector<8x64xf32>, vector<64x64xf32>, vector<8x64xf32> -> vector<8x64xf32>
      %c0_40 = arith.constant 0 : index
      %c0_41 = arith.constant 0 : index
      %54 = vector.load %arg13[%c0_40, %c0_41] : memref<1x64xf32, #tpu.memory_space<vmem>>, vector<1x64xf32>
      %55 = vector.broadcast %54 : vector<1x64xf32> to vector<8x64xf32>
      %56 = arith.addf %53, %55 : vector<8x64xf32>
      %c0_42 = arith.constant 0 : index
      %c0_43 = arith.constant 0 : index
      %57 = vector.load %arg14[%c0_42, %c0_43] : memref<64x256xf32, #tpu.memory_space<vmem>>, vector<64x256xf32>
      %cst_44 = arith.constant dense<0.000000e+00> : vector<8x256xf32>
      %58 = tpu.matmul %56, %57, %cst_44 {dimension_numbers = #tpu.dot_dimension_numbers<[1], [0], [0], [1], [0, 0, 1, 1], [], []>} : vector<8x64xf32>, vector<64x256xf32>, vector<8x256xf32> -> vector<8x256xf32>
      %c0_45 = arith.constant 0 : index
      %c0_46 = arith.constant 0 : index
      %59 = vector.load %arg15[%c0_45, %c0_46] : memref<1x256xf32, #tpu.memory_space<vmem>>, vector<1x256xf32>
      %60 = vector.broadcast %59 : vector<1x256xf32> to vector<8x256xf32>
      %61 = arith.addf %58, %60 : vector<8x256xf32>
      %cst_47 = arith.constant 0.000000e+00 : f32
      %62 = vector.broadcast %cst_47 : f32 to vector<8x256xf32>
      %63 = arith.maximumf %61, %62 : vector<8x256xf32>
      %c0_48 = arith.constant 0 : index
      %c0_49 = arith.constant 0 : index
      %64 = vector.load %arg16[%c0_48, %c0_49] : memref<256x128xf32, #tpu.memory_space<vmem>>, vector<256x128xf32>
      %cst_50 = arith.constant dense<0.000000e+00> : vector<8x128xf32>
      %65 = tpu.matmul %63, %64, %cst_50 {dimension_numbers = #tpu.dot_dimension_numbers<[1], [0], [0], [1], [0, 0, 1, 1], [], []>} : vector<8x256xf32>, vector<256x128xf32>, vector<8x128xf32> -> vector<8x128xf32>
      %c0_51 = arith.constant 0 : index
      %c0_52 = arith.constant 0 : index
      %66 = vector.load %arg17[%c0_51, %c0_52] : memref<1x128xf32, #tpu.memory_space<vmem>>, vector<1x128xf32>
      %67 = vector.broadcast %66 : vector<1x128xf32> to vector<8x128xf32>
      %68 = arith.addf %65, %67 : vector<8x128xf32>
      %c0_53 = arith.constant 0 : index
      %c0_54 = arith.constant 0 : index
      %69 = vector.load %arg18[%c0_53, %c0_54] : memref<8x128xf32, #tpu.memory_space<vmem>>, vector<8x128xf32>
      tpu.vector_store %arg18[%c0_53, %c0_54], %68 {strides = array<i32>} : memref<8x128xf32, #tpu.memory_space<vmem>>, vector<8x128xf32>,
    } else {
    }
    return
  }
  func.func @transform_0(%arg0: i32, %arg1: i32, %arg2: memref<1x1xi32, #tpu.memory_space<smem>>) -> (i32, i32, i32) {
    %0 = arith.index_cast %arg0 : i32 to index
    %1 = arith.index_cast %arg1 : i32 to index
    %2 = memref.load %arg2[%0, %1] : memref<1x1xi32, #tpu.memory_space<smem>>
    %c0_i32 = arith.constant 0 : i32
    %c0_i32_0 = arith.constant 0 : i32
    %c0_i32_1 = arith.constant 0 : i32
    return %2, %c0_i32, %c0_i32_0 : i32, i32, i32
  }
  func.func @transform_1(%arg0: i32, %arg1: i32, %arg2: memref<1x1xi32, #tpu.memory_space<smem>>) -> (i32, i32, i32) {
    %0 = arith.index_cast %arg0 : i32 to index
    %1 = arith.index_cast %arg1 : i32 to index
    %2 = memref.load %arg2[%0, %1] : memref<1x1xi32, #tpu.memory_space<smem>>
    %c0_i32 = arith.constant 0 : i32
    %c0_i32_0 = arith.constant 0 : i32
    %c0_i32_1 = arith.constant 0 : i32
    return %2, %c0_i32, %c0_i32_0 : i32, i32, i32
  }
  func.func @transform_2(%arg0: i32, %arg1: i32, %arg2: memref<1x1xi32, #tpu.memory_space<smem>>) -> (i32, i32, i32, i32) {
    %c0_i32 = arith.constant 0 : i32
    %c0_i32_0 = arith.constant 0 : i32
    %c0_i32_1 = arith.constant 0 : i32
    return %arg0, %arg1, %c0_i32, %c0_i32_0 : i32, i32, i32, i32
  }
  func.func @transform_3(%arg0: i32, %arg1: i32, %arg2: memref<1x1xi32, #tpu.memory_space<smem>>) -> (i32, i32) {
    %c0_i32 = arith.constant 0 : i32
    %c0_i32_0 = arith.constant 0 : i32
    return %arg0, %c0_i32 : i32, i32
  }
  func.func @transform_4(%arg0: i32, %arg1: i32, %arg2: memref<1x1xi32, #tpu.memory_space<smem>>) -> (i32, i32) {
    %c0_i32 = arith.constant 0 : i32
    %c0_i32_0 = arith.constant 0 : i32
    %c0_i32_1 = arith.constant 0 : i32
    return %c0_i32, %c0_i32_0 : i32, i32
  }
  func.func @transform_5(%arg0: i32, %arg1: i32, %arg2: memref<1x1xi32, #tpu.memory_space<smem>>) -> (i32, i32) {
    %c0_i32 = arith.constant 0 : i32
    %c0_i32_0 = arith.constant 0 : i32
    %c0_i32_1 = arith.constant 0 : i32
    return %c0_i32, %c0_i32_0 : i32, i32
  }
  func.func @transform_6(%arg0: i32, %arg1: i32, %arg2: memref<1x1xi32, #tpu.memory_space<smem>>) -> (i32, i32) {
    %c0_i32 = arith.constant 0 : i32
    %c0_i32_0 = arith.constant 0 : i32
    %c0_i32_1 = arith.constant 0 : i32
    return %c0_i32, %c0_i32_0 : i32, i32
  }
  func.func @transform_7(%arg0: i32, %arg1: i32, %arg2: memref<1x1xi32, #tpu.memory_space<smem>>) -> (i32, i32) {
    %c0_i32 = arith.constant 0 : i32
    %c0_i32_0 = arith.constant 0 : i32
    %c0_i32_1 = arith.constant 0 : i32
    return %c0_i32, %c0_i32_0 : i32, i32
  }
  func.func @transform_8(%arg0: i32, %arg1: i32, %arg2: memref<1x1xi32, #tpu.memory_space<smem>>) -> (i32, i32) {
    %c0_i32 = arith.constant 0 : i32
    %c0_i32_0 = arith.constant 0 : i32
    %c0_i32_1 = arith.constant 0 : i32
    return %c0_i32, %c0_i32_0 : i32, i32
  }
  func.func @transform_9(%arg0: i32, %arg1: i32, %arg2: memref<1x1xi32, #tpu.memory_space<smem>>) -> (i32, i32) {
    %c0_i32 = arith.constant 0 : i32
    %c0_i32_0 = arith.constant 0 : i32
    %c0_i32_1 = arith.constant 0 : i32
    return %c0_i32, %c0_i32_0 : i32, i32
  }
  func.func @transform_10(%arg0: i32, %arg1: i32, %arg2: memref<1x1xi32, #tpu.memory_space<smem>>) -> (i32, i32) {
    %c0_i32 = arith.constant 0 : i32
    %c0_i32_0 = arith.constant 0 : i32
    %c0_i32_1 = arith.constant 0 : i32
    return %c0_i32, %c0_i32_0 : i32, i32
  }
  func.func @transform_11(%arg0: i32, %arg1: i32, %arg2: memref<1x1xi32, #tpu.memory_space<smem>>) -> (i32, i32) {
    %c0_i32 = arith.constant 0 : i32
    %c0_i32_0 = arith.constant 0 : i32
    %c0_i32_1 = arith.constant 0 : i32
    return %c0_i32, %c0_i32_0 : i32, i32
  }
  func.func @transform_12(%arg0: i32, %arg1: i32, %arg2: memref<1x1xi32, #tpu.memory_space<smem>>) -> (i32, i32) {
    %c0_i32 = arith.constant 0 : i32
    %c0_i32_0 = arith.constant 0 : i32
    %c0_i32_1 = arith.constant 0 : i32
    return %c0_i32, %c0_i32_0 : i32, i32
  }
  func.func @transform_13(%arg0: i32, %arg1: i32, %arg2: memref<1x1xi32, #tpu.memory_space<smem>>) -> (i32, i32) {
    %c0_i32 = arith.constant 0 : i32
    %c0_i32_0 = arith.constant 0 : i32
    %c0_i32_1 = arith.constant 0 : i32
    return %c0_i32, %c0_i32_0 : i32, i32
  }
  func.func @transform_14(%arg0: i32, %arg1: i32, %arg2: memref<1x1xi32, #tpu.memory_space<smem>>) -> (i32, i32) {
    %c0_i32 = arith.constant 0 : i32
    %c0_i32_0 = arith.constant 0 : i32
    %c0_i32_1 = arith.constant 0 : i32
    return %c0_i32, %c0_i32_0 : i32, i32
  }
  func.func @transform_15(%arg0: i32, %arg1: i32, %arg2: memref<1x1xi32, #tpu.memory_space<smem>>) -> (i32, i32) {
    %c0_i32 = arith.constant 0 : i32
    %c0_i32_0 = arith.constant 0 : i32
    return %arg0, %c0_i32 : i32, i32
  }
}

</mosaic_0001>

<bundles_post_ra>
// kernel: tpu_custom_call.1
= control target key start
LH: loop header
LB: loop body
LE: loop exit
PB: predicated region body
PF: predicated region fallthrough
CT: control target
= control target key end

     0   :  { %s2223_s0 = inlined_call_operand.<no memory space> [shape: s32[1,1], index: 0, kind: input, shape index: {}]   ;;  %s2224_s1 = inlined_call_operand.vmem [shape: f32[8,8,1], index: 1, kind: input, shape index: {}]   ;;  %s2225_s2 = inlined_call_operand.vmem [shape: f32[8,8,32], index: 2, kind: input, shape index: {}]   ;;  %s2226_s3 = inlined_call_operand.vmem [shape: f32[1,1,8,8], index: 3, kind: input, shape index: {}]   ;;  %s2227_s4 = inlined_call_operand.hbm [shape: f32[32,64], index: 4, kind: input, shape index: {}]   ;;  %s2228_s5 = inlined_call_operand.hbm [shape: f32[64,64], index: 5, kind: input, shape index: {}]   ;;  %s2229_s6 = inlined_call_operand.hbm [shape: f32[32,64], index: 6, kind: input, shape index: {}]   ;;  %s2230_s7 = inlined_call_operand.vmem [shape: f32[1,64], index: 7, kind: input, shape index: {}]   ;;  %s2231_s8 = inlined_call_operand.hbm [shape: f32[64,128], index: 8, kind: input, shape index: {}]   ;;  %s2232_s9 = inlined_call_operand.vmem [shape: f32[1,128], index: 9, kind: input, shape index: {}]   ;;  %s2233_s10 = inlined_call_operand.hbm [shape: f32[64,64], index: 10, kind: input, shape index: {}]   ;;  %s2234_s11 = inlined_call_operand.vmem [shape: f32[1,64], index: 11, kind: input, shape index: {}]   ;;  %s2235_s12 = inlined_call_operand.hbm [shape: f32[64,256], index: 12, kind: input, shape index: {}]   ;;  %s2236_s13 = inlined_call_operand.vmem [shape: f32[1,256], index: 13, kind: input, shape index: {}]   ;;  %s2237_s14 = inlined_call_operand.hbm [shape: f32[256,128], index: 14, kind: input, shape index: {}]   ;;  %s2238_s15 = inlined_call_operand.vmem [shape: f32[1,128], index: 15, kind: input, shape index: {}]   ;;  %s2239_s16 = inlined_call_operand.hbm [shape: f32[8,128], index: 16, kind: output, shape index: {}]  }
   0x1   :  { %2240 = sst [smem:[#allocation23_spill]] %s2223_s0 }
   0x2   :  { %22 = vsyncpa [#allocation6], 0 }
   0x3   :  { %23 = vsyncpa [#allocation9], 0 }
   0x4   :  { %24 = vsyncpa [#allocation12], 0 }
   0x5   :  { %25 = vsyncpa [#allocation15], 0 }
   0x6   :  { %26 = vsyncpa [#allocation7], 0  ;;  %s1872_s21 = smov [#allocation8]   ;;  %s1873_s23 = smov [#allocation11]  }
   0x7   :  { %s78_s22 = sshll.u32 %s1872_s21, 4  ;;  %s104_s24 = sshll.u32 %s1873_s23, 4  ;;  %s79_s22 = int_to_ptr.vmem [resolvable:$true] %s78_s22  ;;  %s105_s24 = int_to_ptr.vmem [resolvable:$true] %s104_s24 }
   0x8   :  { %s1710_s25 = scalar_lea.vmem %s79_s22, 1024  ;;  %p1715_p1 = scmp.lt.s32.totalorder %s79_s22, %s79_s22 }
   0x9   :  { %p1711_p0 = scmp.ne.s32.totalorder %s79_s22, %s1710_s25  ;;  %p1716_p2 = scmp.lt.s32.totalorder %s1710_s25, %s1710_s25 }
   0xb   :  { %p1717_p3 = por %p1716_p2, %p1715_p1 }
   0xd   :  { %p1718_p4 = pnand %p1717_p3, %p1711_p0 }
   0xf   :  { %1721 = shalt.err (!%p1718_p4)
}
  0x10   :  { %s1874_s26 = smov 128   ;;  %s1875_s27 = smov 8  }
  0x11   :  { %84 = dma.hbm_to_vmem [thread:$0]  %s2228_s5, 1024, %s79_s22, [#allocation9], %s1874_s26, %s1874_s26, %s1875_s27  }
  0x12   :  { %s1730_s30 = scalar_lea.vmem %s105_s24, 1024  ;;  %p1735_p6 = scmp.lt.s32.totalorder %s105_s24, %s105_s24 }
  0x13   :  { %p1731_p5 = scmp.ne.s32.totalorder %s105_s24, %s1730_s30  ;;  %p1736_p7 = scmp.lt.s32.totalorder %s1730_s30, %s1730_s30 }
  0x15   :  { %p1737_p8 = por %p1736_p7, %p1735_p6 }
  0x17   :  { %p1738_p9 = pnand %p1737_p8, %p1731_p5 }
  0x19   :  { %1741 = shalt.err (!%p1738_p9)
}
  0x1a   :  { %110 = dma.hbm_to_vmem [thread:$0]  %s2231_s8, 1024, %s105_s24, [#allocation12], %s1874_s26, %s1874_s26, %s1875_s27  }
  0x1b   :  { %s1876_s18 = smov [#allocation14]  }
  0x1c   :  { %s132_s19 = sshll.u32 %s1876_s18, 4  ;;  %s133_s19 = int_to_ptr.vmem [resolvable:$true] %s132_s19 }
  0x1d   :  { %s1750_s20 = scalar_lea.vmem %s133_s19, 2048  ;;  %p1755_p11 = scmp.lt.s32.totalorder %s133_s19, %s133_s19 }
  0x1e   :  { %p1751_p10 = scmp.ne.s32.totalorder %s133_s19, %s1750_s20  ;;  %p1756_p12 = scmp.lt.s32.totalorder %s1750_s20, %s1750_s20 }
  0x20   :  { %p1757_p13 = por %p1756_p12, %p1755_p11 }
  0x22   :  { %p1758_p0 = pnand %p1757_p13, %p1751_p10 }
  0x24   :  { %1761 = shalt.err (!%p1758_p0)
}
  0x25   :  { %s1877_s5 = smov 256   ;;  %s1878_s21 = smov 16  }
  0x26   :  { %138 = dma.hbm_to_vmem [thread:$0]  %s2235_s12, 2048, %s133_s19, [#allocation15], %s1877_s5, %s1877_s5, %s1878_s21  }
  0x27   :  { %s1879_s25 = smov [#allocation5]   ;;  %s1880_s8 = smov [#allocation10]  }
  0x28   :  { %s66_s28 = sshll.u32 %s1879_s25, 4  ;;  %s90_s24 = sshll.u32 %s1880_s8, 4  ;;  %s67_s28 = int_to_ptr.vmem [resolvable:$true] %s66_s28  ;;  %s91_s24 = int_to_ptr.vmem [resolvable:$true] %s90_s24 }
  0x29   :  { %s1770_s29 = scalar_lea.vmem %s67_s28, 512  ;;  %p1775_p2 = scmp.lt.s32.totalorder %s67_s28, %s67_s28 }
  0x2a   :  { %p1771_p1 = scmp.ne.s32.totalorder %s67_s28, %s1770_s29  ;;  %p1776_p3 = scmp.lt.s32.totalorder %s1770_s29, %s1770_s29 }
  0x2c   :  { %p1777_p4 = por %p1776_p3, %p1775_p2 }
  0x2e   :  { %p1778_p5 = pnand %p1777_p4, %p1771_p1 }
  0x30   :  { %1781 = shalt.err (!%p1778_p5)
}
  0x31   :  { %72 = dma.hbm_to_vmem [thread:$0]  %s2227_s4, 512, %s67_s28, [#allocation6], %s1874_s26, %s1874_s26, %s1875_s27  }
  0x32   :  { %s1790_s12 = scalar_lea.vmem %s91_s24, 512  ;;  %p1795_p7 = scmp.lt.s32.totalorder %s91_s24, %s91_s24 }
  0x33   :  { %p1791_p6 = scmp.ne.s32.totalorder %s91_s24, %s1790_s12  ;;  %p1796_p8 = scmp.lt.s32.totalorder %s1790_s12, %s1790_s12 }
  0x35   :  { %p1797_p9 = por %p1796_p8, %p1795_p7 }
  0x37   :  { %p1798_p10 = pnand %p1797_p9, %p1791_p6 }
  0x39   :  { %1801 = shalt.err (!%p1798_p10)
}
  0x3a   :  { %96 = dma.hbm_to_vmem [thread:$0]  %s2229_s6, 512, %s91_s24, [#allocation9], %s1874_s26, %s1874_s26, %s1875_s27  }
  0x3b   :  { %s1881_s19 = smov [#allocation13]   ;;  %s1882_s5 = smov [#allocation16]  }
  0x3c   :  { %s118_s20 = sshll.u32 %s1881_s19, 4  ;;  %s146_s4 = sshll.u32 %s1882_s5, 4  ;;  %s119_s20 = int_to_ptr.vmem [resolvable:$true] %s118_s20  ;;  %s147_s4 = int_to_ptr.vmem [resolvable:$true] %s146_s4 }
  0x3d   :  { %s1810_s21 = scalar_lea.vmem %s119_s20, 1024  ;;  %p1815_p12 = scmp.lt.s32.totalorder %s119_s20, %s119_s20 }
  0x3e   :  { %p1811_p11 = scmp.ne.s32.totalorder %s119_s20, %s1810_s21  ;;  %p1816_p13 = scmp.lt.s32.totalorder %s1810_s21, %s1810_s21 }
  0x40   :  { %p1817_p0 = por %p1816_p13, %p1815_p12 }
  0x42   :  { %p1818_p1 = pnand %p1817_p0, %p1811_p11 }
  0x44   :  { %1821 = shalt.err (!%p1818_p1)
}
  0x45   :  { %124 = dma.hbm_to_vmem [thread:$0]  %s2233_s10, 1024, %s119_s20, [#allocation12], %s1874_s26, %s1874_s26, %s1875_s27  }
  0x46   :  { %s1830_s6 = scalar_lea.vmem %s147_s4, 4096  ;;  %p1835_p3 = scmp.lt.s32.totalorder %s147_s4, %s147_s4 }
  0x47   :  { %p1831_p2 = scmp.ne.s32.totalorder %s147_s4, %s1830_s6  ;;  %p1836_p4 = scmp.lt.s32.totalorder %s1830_s6, %s1830_s6 }
  0x49   :  { %p1837_p5 = por %p1836_p4, %p1835_p3 }
  0x4b   :  { %p1838_p6 = pnand %p1837_p5, %p1831_p2 }
  0x4d   :  { %1841 = shalt.err (!%p1838_p6)
}
  0x4e   :  { %152 = dma.hbm_to_vmem [thread:$0]  %s2237_s14, 4096, %s147_s4, [#allocation15], %s1874_s26, %s1874_s26, %s1875_s27  }
  0x4f   :  { %1862 = dma.done.wait [#allocation6], 512  }
  0x50   :  { %1863 = vsyncadd [#allocation6], 4294966784 }
  0x51   :  { %1864 = dma.done.wait [#allocation9], 1536  }
  0x52   :  { %1865 = vsyncadd [#allocation9], 4294965760 }
  0x53   :  { %1866 = dma.done.wait [#allocation12], 2048  }
  0x54   :  { %1867 = vsyncadd [#allocation12], 4294965248 }
  0x55   :  { %1868 = dma.done.wait [#allocation15], 6144  }
  0x56   :  { %1869 = vsyncadd [#allocation15], 4294961152  ;;  %s2241_s24 = sld [smem:[#allocation23_spill]]  ;;  %v1883_v0 = vmov 0   ;;  %vm226_vm0 = vcmask 261120   ;;  %v1884_v9 = vmov 0.0  }
  0x57   :  { %1669 = vset.pattern.permute.xlu1 %v1883_v0  ;;  %1668 = vset.pattern.permute.xlu0 %v1883_v0  ;;  %227 = vst.msk [vmem:[#allocation2] sm:$0xff] %vm226_vm0, %v1884_v9  ;;  %vm1885_vm1 = vmmov 0   ;;  %vm359_vm2 = vcmask 1041409   ;;  %vm361_vm3 = vcmask 1042434   ;;  %vm363_vm4 = vcmask 1043459  }
  0x58   :  { %1572 = vmatprep.subr.mxu0 %v1884_v9  ;;  %1577 = vmatprep.subr.mxu1 %v1884_v9  ;;  %vm365_vm5 = vcmask 1044484   ;;  %vm367_vm6 = vcmask 1045509   ;;  %vm369_vm7 = vcmask 1046534   ;;  %vm371_vm8 = vcmask 1047559  }
  0x59   :  { %1574 = vmatprep.mubr.msk.f32.mxu0 %vm1885_vm1, %v1884_v9  ;;  %1585 = vmatprep.mubr.msk.f32.mxu1 %vm1885_vm1, %v1884_v9  ;;  %vm374_vm9 = vcmask 64512   ;;  %vm557_vm10 = vcmask 523264   ;;  %vm890_vm11 = vcmask 519168  }
  0x5c   :  { %s1477_s29 = sshll.u32 %s2241_s24, 3 }
  0x5d   :  { %p199_p7 = scmp.lt.s32.totalorder %s1477_s29, 7 }
  0x5f   :  { %s2243_s29 = smov (!%p199_p7, %s1477_s29), 7 }
  0x60   :  { %s1478_s30 = sshll.u32 %s2243_s29, 3 }
  0x61   :  { %s202_s26 = scalar_lea.vmem %s2224_s1, %s1478_s30  ;;  %s2030_s12 = scalar_lea.vmem %s2225_s2, %s1478_s30 }
  0x62   :  { %v238_v1 = vld [vmem:[%s202_s26 + $0x10] sm:$0xff]  ;;  %v236_v2 = vld [vmem:[%s202_s26] sm:$0xff]  ;;  %v239_v3 = vld [vmem:[%s202_s26 + $0x18] sm:$0xff] }
  0x63   :  { %256 = vperm.xlu1 %1669, %v238_v1   ;;  %246 = vperm.xlu0 %1668, %v236_v2   ;;  %v237_v4 = vld [vmem:[%s202_s26 + $0x8] sm:$0xff]  ;;  %v240_v6 = vld [vmem:[%s202_s26 + $0x20] sm:$0xff]  ;;  %v243_v7 = vld [vmem:[%s202_s26 + $0x38] sm:$0xff] }
  0x64   :  { %v241_v5 = vld [vmem:[%s202_s26 + $0x28] sm:$0xff]  ;;  %v242_v8 = vld [vmem:[%s202_s26 + $0x30] sm:$0xff]  ;;  %v228_v11 = vld [vmem:[%s2030_s12] sm:$0xff] }
  0x65   :  { %v230_v10 = vld [vmem:[%s2030_s12 + $0x10] sm:$0xff]  ;;  %v231_v16 = vld [vmem:[%s2030_s12 + $0x18] sm:$0xff]  ;;  %v229_v17 = vld [vmem:[%s2030_s12 + $0x8] sm:$0xff] }
  0x66   :  { %v233_v28 = vld [vmem:[%s2030_s12 + $0x28] sm:$0xff]  ;;  %v232_v29 = vld [vmem:[%s2030_s12 + $0x20] sm:$0xff]  ;;  %v235_v44 = vld [vmem:[%s2030_s12 + $0x38] sm:$0xff] }
  0x67   :  { %261 = vperm.xlu1 %1669, %v239_v3   ;;  %251 = vperm.xlu0 %1668, %v237_v4   ;;  %v234_v45 = vld [vmem:[%s2030_s12 + $0x30] sm:$0xff] }
  0x6b   :  { %271 = vperm.xlu1 %1669, %v241_v5   ;;  %266 = vperm.xlu0 %1668, %v240_v6  }
  0x6f   :  { %281 = vperm.xlu1 %1669, %v243_v7   ;;  %276 = vperm.xlu0 %1668, %v242_v8  }
  0xde   :  { %v257_v12 = vpop.permute.xlu1 %256  ;;  %v247_v13 = vpop.permute.xlu0 %246 }
  0xdf   :  { %v286_v14 = vmul.f32 %v257_v12, %v230_v10  ;;  %v284_v15 = vmul.f32 %v247_v13, %v228_v11 }
  0xe1   :  { %v307_v18 = vsel %vm226_vm0, %v286_v14, 0.0  ;;  %v293_v19 = vsel %vm226_vm0, %v284_v15, 0.0 }
  0xe2   :  { %v308_v20 = vrot.slane %v307_v18, 4  ;;  %v294_v21 = vrot.slane %v293_v19, 4  ;;  %v262_v22 = vpop.permute.xlu1 %261  ;;  %v252_v23 = vpop.permute.xlu0 %251 }
  0xe3   :  { %v287_v24 = vmul.f32 %v262_v22, %v231_v16  ;;  %v285_v25 = vmul.f32 %v252_v23, %v229_v17 }
  0xe4   :  { %v309_v26 = vadd.f32 %v308_v20, %v307_v18  ;;  %v295_v27 = vadd.f32 %v294_v21, %v293_v19 }
  0xe5   :  { %v314_v30 = vsel %vm226_vm0, %v287_v24, 0.0  ;;  %v300_v31 = vsel %vm226_vm0, %v285_v25, 0.0 }
  0xe6   :  { %v310_v32 = vrot.slane %v309_v26, 2  ;;  %v296_v33 = vrot.slane %v295_v27, 2  ;;  %v315_v34 = vrot.slane %v314_v30, 4  ;;  %v301_v35 = vrot.slane %v300_v31, 4  ;;  %v272_v36 = vpop.permute.xlu1 %271  ;;  %v267_v37 = vpop.permute.xlu0 %266 }
  0xe7   :  { %v289_v38 = vmul.f32 %v272_v36, %v233_v28  ;;  %v288_v39 = vmul.f32 %v267_v37, %v232_v29  ;;  %v456_v36 = vld [vmem:[#allocation10 + $0x10] sm:$0xff]  ;;  %v455_v37 = vld [vmem:[#allocation10 + $0x8] sm:$0xff] }
  0xe8   :  { %v311_v40 = vadd.f32 %v310_v32, %v309_v26  ;;  %v297_v41 = vadd.f32 %v296_v33, %v295_v27  ;;  %v316_v42 = vadd.f32 %v315_v34, %v314_v30  ;;  %v302_v43 = vadd.f32 %v301_v35, %v300_v31  ;;  %v350_v33 = vld [vmem:[%s2226_s3] sm:$0xff] }
  0xe9   :  { %v328_v46 = vsel %vm226_vm0, %v289_v38, 0.0  ;;  %v321_v47 = vsel %vm226_vm0, %v288_v39, 0.0  ;;  %v457_v35 = vld [vmem:[#allocation10 + $0x18] sm:$0xff]  ;;  %v454_v38 = vld [vmem:[#allocation10] sm:$0xff] }
  0xea   :  { %v317_v48 = vrot.slane %v316_v42, 2  ;;  %v303_v49 = vrot.slane %v302_v43, 2  ;;  %v282_v50 = vpop.permute.xlu1 %281  ;;  %v277_v51 = vpop.permute.xlu0 %276  ;;  %v329_v52 = vrot.slane %v328_v46, 4  ;;  %v322_v53 = vrot.slane %v321_v47, 4  ;;  %1578 = vmatpush3.msra.mxu1 %v457_v35  ;;  %v549_v39 = vld [vmem:[#allocation11 + $0x38] sm:$0xff] }
  0xeb   :  { %v291_v54 = vmul.f32 %v282_v50, %v235_v44  ;;  %v290_v55 = vmul.f32 %v277_v51, %v234_v45  ;;  %v312_v56 = vrot.slane %v311_v40, 1  ;;  %v298_v57 = vrot.slane %v297_v41, 1  ;;  %1579 = vmatprep.subr.mxu1 %v1884_v9  ;;  %v538_v44 = vld [vmem:[#allocation5] sm:$0xff]  ;;  %v544_v50 = vld [vmem:[#allocation11 + $0x10] sm:$0xff]  ;;  %v543_v51 = vld [vmem:[#allocation11 + $0x8] sm:$0xff] }
  0xec   :  { %v318_v58 = vadd.f32 %v317_v48, %v316_v42  ;;  %v304_v59 = vadd.f32 %v303_v49, %v302_v43  ;;  %v330_v60 = vadd.f32 %v329_v52, %v328_v46  ;;  %v323_v61 = vadd.f32 %v322_v53, %v321_v47  ;;  %1580 = vmatpush3.msra.mxu1 %v456_v36  ;;  %v548_v46 = vld [vmem:[#allocation11 + $0x30] sm:$0xff]  ;;  %v547_v47 = vld [vmem:[#allocation11 + $0x28] sm:$0xff]  ;;  %v546_v48 = vld [vmem:[#allocation11 + $0x20] sm:$0xff] }
  0xed   :  { %v342_v62 = vsel %vm226_vm0, %v291_v54, 0.0  ;;  %v335_v63 = vsel %vm226_vm0, %v290_v55, 0.0  ;;  %v299_v6 = vadd.f32 %v298_v57, %v297_v41  ;;  %v313_v11 = vadd.f32 %v312_v56, %v311_v40  ;;  %1581 = vmatprep.subr.mxu1 %v1884_v9  ;;  %v349_v40 = vld [vmem:[#allocation2] sm:$0xff]  ;;  %v542_v52 = vld [vmem:[#allocation11] sm:$0xff]  ;;  %v539_v53 = vld [vmem:[#allocation5 + $0x8] sm:$0xff] }
  0xee   :  { %v319_v0 = vrot.slane %v318_v58, 1  ;;  %v305_v1 = vrot.slane %v304_v59, 1  ;;  %v343_v2 = vrot.slane %v342_v62, 4  ;;  %v336_v3 = vrot.slane %v335_v63, 4  ;;  %1582 = vmatpush3.msra.mxu1 %v455_v37  ;;  %v545_v49 = vld [vmem:[#allocation11 + $0x18] sm:$0xff]  ;;  %v540_v54 = vld [vmem:[#allocation5 + $0x10] sm:$0xff] }
  0xef   :  { %v331_v4 = vrot.slane %v330_v60, 2  ;;  %v324_v5 = vrot.slane %v323_v61, 2  ;;  %1583 = vmatprep.subr.mxu1 %v1884_v9  ;;  %v541_v55 = vld [vmem:[#allocation5 + $0x18] sm:$0xff]  ;;  %v771_v57 = vld [vmem:[#allocation8 + $0x30] sm:$0xff] }
  0xf0   :  { %v306_v7 = vadd.f32 %v305_v1, %v304_v59  ;;  %v344_v8 = vadd.f32 %v343_v2, %v342_v62  ;;  %v337_v10 = vadd.f32 %v336_v3, %v335_v63  ;;  %v320_v14 = vadd.f32 %v319_v0, %v318_v58  ;;  %1584 = vmatpush3.msra.mxu1 %v454_v38  ;;  %v772_v56 = vld [vmem:[#allocation8 + $0x38] sm:$0xff]  ;;  %v770_v58 = vld [vmem:[#allocation8 + $0x28] sm:$0xff]  ;;  %v769_v59 = vld [vmem:[#allocation8 + $0x20] sm:$0xff] }
  0xf1   :  { %v332_v12 = vadd.f32 %v331_v4, %v330_v60  ;;  %v325_v13 = vadd.f32 %v324_v5, %v323_v61  ;;  %1588 = vmatprep.subr.mxu1 %v549_v39  ;;  %v768_v60 = vld [vmem:[#allocation8 + $0x18] sm:$0xff]  ;;  %v767_v61 = vld [vmem:[#allocation8 + $0x10] sm:$0xff]  ;;  %v766_v62 = vld [vmem:[#allocation8 + $0x8] sm:$0xff]  ;;  %v1886_v0 = vmov 1966171168   ;;  %v672_v2 = vlaneseq }
  0xf2   :  { %v360_v15 = vsel %vm359_vm2, %v306_v7, %v299_v6  ;;  %v345_v16 = vrot.slane %v344_v8, 2  ;;  %v338_v17 = vrot.slane %v337_v10, 2  ;;  %v765_v63 = vld [vmem:[#allocation8] sm:$0xff]  ;;  %v670_v1 = vunpack.c.l.s4 %v1886_v0  ;;  %v1482_v5 = vld [vmem:[%s2230_s7] ss:$0 sm:$0xff]  ;;  %s1887_s7 = smov 64  }
  0xf3   :  { %v333_v18 = vrot.slane %v332_v12, 1  ;;  %v326_v19 = vrot.slane %v325_v13, 1  ;;  %v362_v20 = vsel %vm361_vm3, %v313_v11, %v360_v15  ;;  %v2070_v4 = vshrl.u32 %v672_v2, 7  ;;  %v1132_v0 = vld [vmem:[#allocation13 + $0x8] sm:$0xff]  ;;  %v1248_v2 = vld [vmem:[#allocation14 + $0x78] sm:$0xff] }
  0xf4   :  { %v346_v21 = vadd.f32 %v345_v16, %v344_v8  ;;  %v339_v22 = vadd.f32 %v338_v17, %v337_v10  ;;  %v364_v23 = vsel %vm363_vm4, %v320_v14, %v362_v20  ;;  %v671_v3 = vunpack.c.0.s8 %v670_v1  ;;  %v1484_v17 = vld [vmem:[%s2232_s9] ss:$0 sm:$0xff]  ;;  %v1131_v1 = vld [vmem:[#allocation13] sm:$0xff] }
  0xf5   :  { %v334_v24 = vadd.f32 %v333_v18, %v332_v12  ;;  %v327_v25 = vadd.f32 %v326_v19, %v325_v13 }
  0xf6   :  { %v340_v26 = vrot.slane %v339_v22, 1  ;;  %v347_v27 = vrot.slane %v346_v21, 1  ;;  %v674_v8 = vsub.s32 %v671_v3, %v2070_v4  ;;  %v1247_v3 = vld [vmem:[#allocation14 + $0x70] sm:$0xff] }
  0xf7   :  { %v366_v28 = vsel %vm365_vm5, %v327_v25, %v364_v23 }
  0xf8   :  { %v341_v29 = vadd.f32 %v340_v26, %v339_v22  ;;  %v348_v30 = vadd.f32 %v347_v27, %v346_v21  ;;  %v368_v31 = vsel %vm367_vm6, %v334_v24, %v366_v28  ;;  %v2080_v24 = vsub.s32 0, %v2070_v4 }
  0xfa   :  { %v370_v32 = vsel %vm369_vm7, %v341_v29, %v368_v31 }
  0xfb   :  { %v372_v34 = vsel %vm371_vm8, %v348_v30, %v370_v32 }
  0xfc   :  { %1573 = vmatpush3.msra.mxu0 %v372_v34 }
  0xfd   :  { %1575 = vmatmul.mubr.msk.f32.vlgmr.msra.gmra.mxu0 %vm374_vm9, %v350_v33  ;;  %1632 = vmatprep.subr.mxu0 %v1884_v9 }
  0xfe   :  { %1648 = vmatprep.mubr.msk.f32.mxu0 %vm1885_vm1, %v1884_v9 }
 0x1bd   :  { %v444_v41 = vpop.f32.mrf.mxu0 }
 0x1be   :  { %v448_v42 = vadd.f32 %v444_v41, %v349_v40 }
 0x1bf   :  { %v1576_v43 = vpop.f32.mrf.mxu0 }
 0x1c0   :  { %449 = vst.msk [vmem:[#allocation2] sm:$0xff] %vm226_vm0, %v448_v42 }
 0x1c7   :  { %v453_v45 = vld [vmem:[#allocation2] sm:$0xff] }
 0x1c8   :  { %1586 = vmatmul.mubr.msk.f32.vlgmr.msra.gmra.mxu1 %vm226_vm0, %v453_v45 }
 0x1c9   :  { %1589 = vmatpush3.msra.mxu1 %v549_v39  ;;  %1604 = vmatprep.mubr.msk.f32.mxu1 %vm557_vm10, %v538_v44 }
 0x1ca   :  { %1590 = vmatprep.subr.mxu1 %v548_v46 }
 0x1cb   :  { %1591 = vmatpush3.msra.mxu1 %v548_v46 }
 0x1cc   :  { %1592 = vmatprep.subr.mxu1 %v547_v47 }
 0x1cd   :  { %1593 = vmatpush3.msra.mxu1 %v547_v47 }
 0x1ce   :  { %1594 = vmatprep.subr.mxu1 %v546_v48 }
 0x1cf   :  { %1595 = vmatpush3.msra.mxu1 %v546_v48 }
 0x1d0   :  { %1596 = vmatprep.subr.mxu1 %v545_v49 }
 0x1d1   :  { %1597 = vmatpush3.msra.mxu1 %v545_v49 }
 0x1d2   :  { %1598 = vmatprep.subr.mxu1 %v544_v50 }
 0x1d3   :  { %1599 = vmatpush3.msra.mxu1 %v544_v50 }
 0x1d4   :  { %1600 = vmatprep.subr.mxu1 %v543_v51 }
 0x1d5   :  { %1601 = vmatpush3.msra.mxu1 %v543_v51 }
 0x1d6   :  { %1602 = vmatprep.subr.mxu1 %v542_v52 }
 0x1d7   :  { %1603 = vmatpush3.msra.mxu1 %v542_v52 }
 0x1d8   :  { %1605 = vmatmul.mubr.msk.f32.vlgmr.msra.gmra.mxu1 %vm557_vm10, %v539_v53  ;;  %1610 = vmatprep.subr.mxu1 %v772_v56 }
 0x1d9   :  { %1607 = vmatprep.mubr.msk.f32.mxu1 %vm557_vm10, %v540_v54  ;;  %1611 = vmatpush3.msra.mxu1 %v772_v56 }
 0x1da   :  { %1612 = vmatprep.subr.mxu1 %v771_v57 }
 0x1db   :  { %1613 = vmatpush3.msra.mxu1 %v771_v57 }
 0x1dc   :  { %1608 = vmatmul.mubr.msk.f32.gmra.mxu1 %vm557_vm10, %v541_v55  ;;  %1614 = vmatprep.subr.mxu1 %v770_v58 }
 0x1dd   :  { %1615 = vmatpush3.msra.mxu1 %v770_v58  ;;  %v1138_v58 = vld [vmem:[#allocation13 + $0x38] sm:$0xff] }
 0x1de   :  { %1616 = vmatprep.subr.mxu1 %v769_v59  ;;  %1633 = vmatpush3.msra.mxu0 %v1138_v58 }
 0x1df   :  { %1617 = vmatpush3.msra.mxu1 %v769_v59  ;;  %v1137_v59 = vld [vmem:[#allocation13 + $0x30] sm:$0xff]  ;;  %1634 = vmatprep.subr.mxu0 %v1884_v9 }
 0x1e0   :  { %1618 = vmatprep.subr.mxu1 %v768_v60  ;;  %1635 = vmatpush3.msra.mxu0 %v1137_v59 }
 0x1e1   :  { %1619 = vmatpush3.msra.mxu1 %v768_v60  ;;  %v1136_v60 = vld [vmem:[#allocation13 + $0x28] sm:$0xff]  ;;  %1636 = vmatprep.subr.mxu0 %v1884_v9 }
 0x1e2   :  { %1620 = vmatprep.subr.mxu1 %v767_v61  ;;  %1637 = vmatpush3.msra.mxu0 %v1136_v60 }
 0x1e3   :  { %1621 = vmatpush3.msra.mxu1 %v767_v61  ;;  %v1135_v61 = vld [vmem:[#allocation13 + $0x20] sm:$0xff]  ;;  %1638 = vmatprep.subr.mxu0 %v1884_v9 }
 0x1e4   :  { %1622 = vmatprep.subr.mxu1 %v766_v62  ;;  %1639 = vmatpush3.msra.mxu0 %v1135_v61 }
 0x1e5   :  { %1623 = vmatpush3.msra.mxu1 %v766_v62  ;;  %v1134_v62 = vld [vmem:[#allocation13 + $0x18] sm:$0xff]  ;;  %1640 = vmatprep.subr.mxu0 %v1884_v9 }
 0x1e6   :  { %1624 = vmatprep.subr.mxu1 %v765_v63  ;;  %1641 = vmatpush3.msra.mxu0 %v1134_v62 }
 0x1e7   :  { %1625 = vmatpush3.msra.mxu1 %v765_v63  ;;  %v1133_v63 = vld [vmem:[#allocation13 + $0x10] sm:$0xff]  ;;  %1642 = vmatprep.subr.mxu0 %v1884_v9 }
 0x1e8   :  { %1643 = vmatpush3.msra.mxu0 %v1133_v63  ;;  %1280 = vmatprep.subr.mxu1 %v1248_v2 }
 0x1e9   :  { %1644 = vmatprep.subr.mxu0 %v1884_v9 }
 0x1ea   :  { %1645 = vmatpush3.msra.mxu0 %v1132_v0 }
 0x1eb   :  { %1646 = vmatprep.subr.mxu0 %v1884_v9 }
 0x1ec   :  { %1647 = vmatpush3.msra.mxu0 %v1131_v1 }
 0x288   :  { %v534_v6 = vpop.f32.mrf.mxu1 }
 0x289   :  { %v535_v7 = vadd.f32 %v1482_v5, %v534_v6  ;;  %v1246_v5 = vld [vmem:[#allocation14 + $0x68] sm:$0xff]  ;;  %v1245_v6 = vld [vmem:[#allocation14 + $0x60] sm:$0xff] }
 0x28a   :  { %v1587_v10 = vpop.f32.mrf.mxu1 }
 0x28b   :  { %v668_v11 = vcombine.high %v535_v7, %v535_v7  ;;  %v675_v12 = vrot.slane %v535_v7, %v674_v8  ;;  %v1244_v7 = vld [vmem:[#allocation14 + $0x58] sm:$0xff]  ;;  %v1242_v10 = vld [vmem:[#allocation14 + $0x48] sm:$0xff] }
 0x28d   :  { %v682_v13 = vrot.slane %v668_v11, %v674_v8  ;;  %v683_v14 = vcombine.high %v675_v12, %v675_v12  ;;  %v691_v18 = vrot.slane %v675_v12, %v674_v8  ;;  %v1241_v11 = vld [vmem:[#allocation14 + $0x40] sm:$0xff]  ;;  %v1240_v12 = vld [vmem:[#allocation14 + $0x38] sm:$0xff] }
 0x28f   :  { %v684_v15 = vcombine.high %v682_v13, %v682_v13  ;;  %v705_v16 = vrot.slane %v683_v14, %v674_v8  ;;  %v698_v23 = vrot.slane %v682_v13, %v674_v8  ;;  %v713_v26 = vcombine.high %v691_v18, %v691_v18  ;;  %v1239_v13 = vld [vmem:[#allocation14 + $0x30] sm:$0xff]  ;;  %v1237_v14 = vld [vmem:[#allocation14 + $0x20] sm:$0xff] }
 0x290   :  { %v720_v35 = vrot.slane %v691_v18, %v2080_v24 }
 0x291   :  { %v712_v20 = vrot.slane %v684_v15, %v674_v8  ;;  %v715_v21 = vcombine.high %v705_v16, %v705_v16  ;;  %v714_v34 = vcombine.high %v698_v23, %v698_v23  ;;  %v724_v37 = vrot.slane %v705_v16, %v2080_v24  ;;  %v1243_v8 = vld [vmem:[#allocation14 + $0x50] sm:$0xff]  ;;  %v1236_v15 = vld [vmem:[#allocation14 + $0x18] sm:$0xff] }
 0x292   :  { %v728_v38 = vrot.slane %v713_v26, %v2080_v24  ;;  %v736_v43 = vrot.slane %v698_v23, %v2080_v24 }
 0x293   :  { %v716_v30 = vcombine.high %v712_v20, %v712_v20  ;;  %v732_v32 = vrot.slane %v715_v21, %v2080_v24  ;;  %v740_v48 = vrot.slane %v712_v20, %v2080_v24  ;;  %v744_v49 = vrot.slane %v714_v34, %v2080_v24 }
 0x295   :  { %v748_v46 = vrot.slane %v716_v30, %v2080_v24 }
 0x298   :  { %v1606_v19 = vpop.f32.mrf.mxu1 }
 0x299   :  { %v642_v22 = vadd.f32 %v1606_v19, %v1484_v17 }
 0x29a   :  { %v636_v25 = vpop.f32.mrf.mxu1 }
 0x29b   :  { %v637_v27 = vadd.f32 %v1484_v17, %v636_v25  ;;  %1047 = vrot.lane.b32.xlu0 %v642_v22, %s1887_s7  ;;  %v660_v28 = vcombine.high %v642_v22, %v642_v22  ;;  %v759_v45 = vmul.f32 %v728_v38, %v642_v22 }
 0x29c   :  { %v1609_v29 = vpop.f32.mrf.mxu1 }
 0x29d   :  { %v652_v31 = vadd.f32 %v1609_v29, %v1484_v17  ;;  %1049 = vrot.lane.b32.xlu1 %v660_v28, %s1887_s7  ;;  %v659_v33 = vcombine.high %v637_v27, %v637_v27  ;;  %v760_v40 = vmul.f32 %v732_v32, %v660_v28  ;;  %v757_v42 = vmul.f32 %v720_v35, %v637_v27 }
 0x29e   :  { %v646_v36 = vpop.f32.mrf.mxu1 }
 0x29f   :  { %v662_v39 = vcombine.high %v652_v31, %v652_v31  ;;  %v647_v41 = vadd.f32 %v1484_v17, %v646_v36  ;;  %1043 = vrot.lane.b32.xlu0 %v637_v27, %s1887_s7  ;;  %v758_v44 = vmul.f32 %v724_v37, %v659_v33  ;;  %v782_v52 = vcombine.low %v759_v45, %v760_v40 }
 0x2a0   :  { %v763_v55 = vmul.f32 %v744_v49, %v652_v31 }
 0x2a1   :  { %1045 = vrot.lane.b32.xlu1 %v659_v33, %s1887_s7  ;;  %v661_v47 = vcombine.high %v647_v41, %v647_v41  ;;  %v781_v50 = vcombine.low %v757_v42, %v758_v44  ;;  %v764_v51 = vmul.f32 %v748_v46, %v662_v39  ;;  %v761_v53 = vmul.f32 %v736_v43, %v647_v41 }
 0x2a3   :  { %1051 = vrot.lane.b32.xlu0 %v647_v41, %s1887_s7  ;;  %v762_v54 = vmul.f32 %v740_v48, %v661_v47  ;;  %1626 = vmatprep.mubr.msk.f32.mxu1 %vm557_vm10, %v781_v50  ;;  %v784_v57 = vcombine.low %v763_v55, %v764_v51 }
 0x2a4   :  { %1627 = vmatmul.mubr.msk.f32.vlgmr.msra.gmra.mxu1 %vm557_vm10, %v782_v52 }
 0x2a5   :  { %1053 = vrot.lane.b32.xlu1 %v661_v47, %s1887_s7  ;;  %v783_v56 = vcombine.low %v761_v53, %v762_v54  ;;  %1281 = vmatpush1.msra.mxu1 %v1247_v3 }
 0x2a6   :  { %1282 = vmatprep.subr.mxu1 %v1246_v5 }
 0x2a7   :  { %1055 = vrot.lane.b32.xlu0 %v652_v31, %s1887_s7  ;;  %1629 = vmatprep.mubr.msk.f32.mxu1 %vm557_vm10, %v783_v56 }
 0x2a8   :  { %1630 = vmatmul.mubr.msk.f32.gmra.mxu1 %vm557_vm10, %v784_v57 }
 0x2a9   :  { %1057 = vrot.lane.b32.xlu1 %v662_v39, %s1887_s7  ;;  %1328 = vmatprep.mubr.f32.mxu1 %v1884_v9  ;;  %v1238_v9 = vld [vmem:[#allocation14 + $0x28] sm:$0xff] }
 0x2aa   :  { %1283 = vmatpush1.msra.mxu1 %v1245_v6 }
 0x2ab   :  { %1284 = vmatprep.subr.mxu1 %v1244_v7 }
 0x2ac   :  { %1285 = vmatpush1.msra.mxu1 %v1243_v8 }
 0x2ad   :  { %1286 = vmatprep.subr.mxu1 %v1242_v10 }
 0x2ae   :  { %1287 = vmatpush1.msra.mxu1 %v1241_v11 }
 0x2af   :  { %1288 = vmatprep.subr.mxu1 %v1240_v12 }
 0x2b0   :  { %1289 = vmatpush1.msra.mxu1 %v1239_v13 }
 0x2b1   :  { %1290 = vmatprep.subr.mxu1 %v1238_v9 }
 0x2b2   :  { %1291 = vmatpush1.msra.mxu1 %v1237_v14 }
 0x2b3   :  { %1292 = vmatprep.subr.mxu1 %v1236_v15 }
 0x364   :  { %v1628_v16 = vpop.f32.mrf.mxu1 }
 0x365   :  { %v2110_v17 = vcombine.high %v1628_v16, %v1628_v16  ;;  %v905_v18 = vsel %vm890_vm11, %v1628_v16, -inf }
 0x366   :  { %v906_v19 = vrot.slane %v905_v18, 4  ;;  %v2113_v20 = vpop.f32.mrf.mxu1 }
 0x367   :  { %v912_v21 = vsel %vm890_vm11, %v2110_v17, -inf  ;;  %v2119_v22 = vcombine.high %v2113_v20, %v2113_v20  ;;  %v891_v23 = vsel %vm890_vm11, %v2113_v20, -inf }
 0x368   :  { %v907_v25 = vmax.f32 %v905_v18, %v906_v19  ;;  %v913_v26 = vrot.slane %v912_v21, 4  ;;  %v892_v27 = vrot.slane %v891_v23, 4  ;;  %v2123_v28 = vpop.f32.mrf.mxu1 }
 0x369   :  { %v898_v29 = vsel %vm890_vm11, %v2119_v22, -inf  ;;  %v2129_v30 = vcombine.high %v2123_v28, %v2123_v28  ;;  %v933_v31 = vsel %vm890_vm11, %v2123_v28, -inf }
 0x36a   :  { %v908_v32 = vrot.slane %v907_v25, 2  ;;  %v914_v33 = vmax.f32 %v912_v21, %v913_v26  ;;  %v893_v34 = vmax.f32 %v891_v23, %v892_v27  ;;  %v899_v35 = vrot.slane %v898_v29, 4  ;;  %v2133_v36 = vpop.f32.mrf.mxu1 }
 0x36b   :  { %v934_v37 = vrot.slane %v933_v31, 4  ;;  %v940_v38 = vsel %vm890_vm11, %v2129_v30, -inf  ;;  %v2139_v39 = vcombine.high %v2133_v36, %v2133_v36  ;;  %v919_v40 = vsel %vm890_vm11, %v2133_v36, -inf }
 0x36c   :  { %v909_v41 = vmax.f32 %v907_v25, %v908_v32  ;;  %v915_v42 = vrot.slane %v914_v33, 2  ;;  %v894_v43 = vrot.slane %v893_v34, 2  ;;  %v900_v44 = vmax.f32 %v898_v29, %v899_v35 }
 0x36d   :  { %v935_v45 = vmax.f32 %v933_v31, %v934_v37  ;;  %v941_v46 = vrot.slane %v940_v38, 4  ;;  %v920_v47 = vrot.slane %v919_v40, 4  ;;  %v926_v48 = vsel %vm890_vm11, %v2139_v39, -inf }
 0x36e   :  { %v910_v49 = vrot.slane %v909_v41, 1  ;;  %v916_v50 = vmax.f32 %v914_v33, %v915_v42  ;;  %v895_v51 = vmax.f32 %v893_v34, %v894_v43  ;;  %v901_v52 = vrot.slane %v900_v44, 2 }
 0x36f   :  { %v936_v53 = vrot.slane %v935_v45, 2  ;;  %v942_v54 = vmax.f32 %v940_v38, %v941_v46  ;;  %v921_v55 = vmax.f32 %v919_v40, %v920_v47  ;;  %v927_v56 = vrot.slane %v926_v48, 4 }
 0x370   :  { %v911_v57 = vmax.f32 %v909_v41, %v910_v49  ;;  %v917_v58 = vrot.slane %v916_v50, 1  ;;  %v896_v59 = vrot.slane %v895_v51, 1  ;;  %v902_v60 = vmax.f32 %v900_v44, %v901_v52 }
 0x371   :  { %v937_v61 = vmax.f32 %v935_v45, %v936_v53  ;;  %v943_v62 = vrot.slane %v942_v54, 2  ;;  %v922_v63 = vrot.slane %v921_v55, 2  ;;  %v928_v0 = vmax.f32 %v926_v48, %v927_v56 }
 0x372   :  { %v918_v1 = vmax.f32 %v916_v50, %v917_v58  ;;  %v949_v2 = vsub.f32 %v1628_v16, %v911_v57  ;;  %v897_v3 = vmax.f32 %v895_v51, %v896_v59  ;;  %v903_v5 = vrot.slane %v902_v60, 1 }
 0x373   :  { %v938_v6 = vrot.slane %v937_v61, 1  ;;  %v944_v7 = vmax.f32 %v942_v54, %v943_v62  ;;  %v923_v8 = vmax.f32 %v921_v55, %v922_v63  ;;  %v929_v10 = vrot.slane %v928_v0, 2 }
 0x374   :  { %v950_v11 = vsub.f32 %v2110_v17, %v918_v1  ;;  %v959_v12 = vmul.f32 1.442695, %v949_v2  ;;  %v904_v13 = vmax.f32 %v902_v60, %v903_v5  ;;  %v947_v9 = vsub.f32 %v2113_v20, %v897_v3 }
 0x375   :  { %v939_v14 = vmax.f32 %v937_v61, %v938_v6  ;;  %v945_v15 = vrot.slane %v944_v7, 1  ;;  %v924_v18 = vrot.slane %v923_v8, 1  ;;  %v930_v19 = vmax.f32 %v928_v0, %v929_v10 }
 0x376   :  { %1670 = vpow2.f32 %v959_v12  ;;  %v961_v21 = vmul.f32 1.442695, %v950_v11  ;;  %v948_v16 = vsub.f32 %v2119_v22, %v904_v13  ;;  %v955_v23 = vmul.f32 1.442695, %v947_v9 }
 0x377   :  { %v946_v25 = vmax.f32 %v944_v7, %v945_v15  ;;  %v953_v26 = vsub.f32 %v2123_v28, %v939_v14  ;;  %v925_v27 = vmax.f32 %v923_v8, %v924_v18  ;;  %v931_v29 = vrot.slane %v930_v19, 1 }
 0x378   :  { %1672 = vpow2.f32 %v961_v21  ;;  %v957_v17 = vmul.f32 1.442695, %v948_v16 }
 0x379   :  { %1674 = vpow2.f32 %v955_v23  ;;  %v954_v31 = vsub.f32 %v2129_v30, %v946_v25  ;;  %v967_v20 = vmul.f32 1.442695, %v953_v26  ;;  %v932_v32 = vmax.f32 %v930_v19, %v931_v29 }
 0x37a   :  { %1676 = vpow2.f32 %v957_v17  ;;  %v951_v33 = vsub.f32 %v2133_v36, %v925_v27  ;;  %v1048_v17 = vpop.permute.xlu0 %1047 }
 0x37b   :  { %1678 = vpow2.f32 %v967_v20  ;;  %v969_v34 = vmul.f32 1.442695, %v954_v31  ;;  %v952_v22 = vsub.f32 %v2139_v39, %v932_v32 }
 0x37c   :  { %v963_v35 = vmul.f32 1.442695, %v951_v33 }
 0x37d   :  { %1680 = vpow2.f32 %v969_v34  ;;  %v965_v37 = vmul.f32 1.442695, %v952_v22  ;;  %v1050_v22 = vpop.permute.xlu1 %1049 }
 0x37e   :  { %1682 = vpow2.f32 %v963_v35 }
 0x37f   :  { %1684 = vpow2.f32 %v965_v37 }
 0x383   :  { %v2152_v28 = vpop.eup %1670 }
 0x384   :  { %v985_v38 = vsel %vm890_vm11, %v2152_v28, 0.0 }
 0x385   :  { %v2156_v30 = vpop.eup %1672  ;;  %v986_v40 = vrot.slane %v985_v38, 4 }
 0x386   :  { %v2158_v41 = vpop.eup %1674  ;;  %v992_v36 = vsel %vm890_vm11, %v2156_v30, 0.0 }
 0x387   :  { %v2162_v42 = vpop.eup %1676  ;;  %v987_v39 = vadd.f32 %v986_v40, %v985_v38  ;;  %v993_v43 = vrot.slane %v992_v36, 4  ;;  %v971_v44 = vsel %vm890_vm11, %v2158_v41, 0.0 }
 0x388   :  { %v2166_v45 = vpop.eup %1678  ;;  %v972_v46 = vrot.slane %v971_v44, 4  ;;  %v978_v47 = vsel %vm890_vm11, %v2162_v42, 0.0 }
 0x389   :  { %v988_v48 = vrot.slane %v987_v39, 2  ;;  %v994_v49 = vadd.f32 %v993_v43, %v992_v36  ;;  %v979_v50 = vrot.slane %v978_v47, 4  ;;  %v1013_v51 = vsel %vm890_vm11, %v2166_v45, 0.0 }
 0x38a   :  { %v2172_v52 = vpop.eup %1680  ;;  %v973_v53 = vadd.f32 %v972_v46, %v971_v44  ;;  %v1014_v54 = vrot.slane %v1013_v51, 4  ;;  %v1046_v44 = vpop.permute.xlu1 %1045 }
 0x38b   :  { %v2174_v55 = vpop.eup %1682  ;;  %v989_v56 = vadd.f32 %v988_v48, %v987_v39  ;;  %v995_v57 = vrot.slane %v994_v49, 2  ;;  %v980_v58 = vadd.f32 %v979_v50, %v978_v47  ;;  %v1020_v59 = vsel %vm890_vm11, %v2172_v52, 0.0  ;;  %v1044_v39 = vpop.permute.xlu0 %1043 }
 0x38c   :  { %v2178_v60 = vpop.eup %1684  ;;  %v974_v61 = vrot.slane %v973_v53, 2  ;;  %v1015_v62 = vadd.f32 %v1014_v54, %v1013_v51  ;;  %v1021_v63 = vrot.slane %v1020_v59, 4  ;;  %v999_v0 = vsel %vm890_vm11, %v2174_v55, 0.0 }
 0x38d   :  { %v990_v1 = vrot.slane %v989_v56, 1  ;;  %v996_v2 = vadd.f32 %v995_v57, %v994_v49  ;;  %v981_v3 = vrot.slane %v980_v58, 2  ;;  %v1000_v5 = vrot.slane %v999_v0, 4 }
 0x38e   :  { %v975_v6 = vadd.f32 %v974_v61, %v973_v53  ;;  %v1016_v7 = vrot.slane %v1015_v62, 2  ;;  %v1022_v8 = vadd.f32 %v1021_v63, %v1020_v59  ;;  %v1006_v10 = vsel %vm890_vm11, %v2178_v60, 0.0  ;;  %v1054_v51 = vpop.permute.xlu1 %1053 }
 0x38f   :  { %v991_v11 = vadd.f32 %v990_v1, %v989_v56  ;;  %v997_v12 = vrot.slane %v996_v2, 1  ;;  %v982_v13 = vadd.f32 %v981_v3, %v980_v58  ;;  %v1001_v9 = vadd.f32 %v1000_v5, %v999_v0  ;;  %v1052_v47 = vpop.permute.xlu0 %1051 }
 0x390   :  { %v976_v14 = vrot.slane %v975_v6, 1  ;;  %v1017_v15 = vadd.f32 %v1016_v7, %v1015_v62  ;;  %v1023_v18 = vrot.slane %v1022_v8, 2  ;;  %v1007_v19 = vrot.slane %v1006_v10, 4 }
 0x391   :  { %v998_v21 = vadd.f32 %v997_v12, %v996_v2  ;;  %1686 = vrcp.f32 %v991_v11  ;;  %v983_v16 = vrot.slane %v982_v13, 1  ;;  %v1002_v23 = vrot.slane %v1001_v9, 2 }
 0x392   :  { %v977_v25 = vadd.f32 %v976_v14, %v975_v6  ;;  %v1018_v26 = vrot.slane %v1017_v15, 1  ;;  %v1024_v27 = vadd.f32 %v1023_v18, %v1022_v8  ;;  %v1008_v29 = vadd.f32 %v1007_v19, %v1006_v10  ;;  %v1058_v10 = vpop.permute.xlu1 %1057 }
 0x393   :  { %1688 = vrcp.f32 %v998_v21  ;;  %v984_v31 = vadd.f32 %v983_v16, %v982_v13  ;;  %v1003_v20 = vadd.f32 %v1002_v23, %v1001_v9  ;;  %v1056_v2 = vpop.permute.xlu0 %1055 }
 0x394   :  { %1690 = vrcp.f32 %v977_v25  ;;  %v1019_v32 = vadd.f32 %v1018_v26, %v1017_v15  ;;  %v1025_v33 = vrot.slane %v1024_v27, 1  ;;  %v1009_v34 = vrot.slane %v1008_v29, 2 }
 0x395   :  { %1692 = vrcp.f32 %v984_v31  ;;  %v1004_v35 = vrot.slane %v1003_v20, 1 }
 0x396   :  { %v1026_v37 = vadd.f32 %v1025_v33, %v1024_v27  ;;  %1694 = vrcp.f32 %v1019_v32  ;;  %v1010_v38 = vadd.f32 %v1009_v34, %v1008_v29 }
 0x397   :  { %v1005_v40 = vadd.f32 %v1004_v35, %v1003_v20 }
 0x398   :  { %1696 = vrcp.f32 %v1026_v37  ;;  %v1011_v36 = vrot.slane %v1010_v38, 1 }
 0x399   :  { %1698 = vrcp.f32 %v1005_v40 }
 0x39a   :  { %v1012_v43 = vadd.f32 %v1011_v36, %v1010_v38 }
 0x39c   :  { %1700 = vrcp.f32 %v1012_v43 }
 0x39e   :  { %v1687_v46 = vpop.eup %1686 }
 0x39f   :  { %v1037_v48 = vmul.f32 %v1687_v46, %v2152_v28 }
 0x3a0   :  { %v1689_v49 = vpop.eup %1688 }
 0x3a1   :  { %v1691_v50 = vpop.eup %1690  ;;  %v1038_v53 = vmul.f32 %v1689_v49, %v2156_v30  ;;  %v1069_v54 = vmul.f32 %v1048_v17, %v1037_v48 }
 0x3a2   :  { %v1693_v56 = vpop.eup %1692  ;;  %v1035_v57 = vmul.f32 %v1691_v50, %v2158_v41 }
 0x3a3   :  { %v1695_v58 = vpop.eup %1694  ;;  %v1070_v59 = vmul.f32 %v1050_v22, %v1038_v53  ;;  %v1089_v61 = vsel %vm890_vm11, %v1069_v54, 0.0  ;;  %v1036_v62 = vmul.f32 %v1693_v56, %v2162_v42 }
 0x3a4   :  { %v1090_v63 = vrot.slane %v1089_v61, 4  ;;  %v1067_v0 = vmul.f32 %v1044_v39, %v1035_v57  ;;  %v1041_v1 = vmul.f32 %v1695_v58, %v2166_v45 }
 0x3a5   :  { %v1697_v28 = vpop.eup %1696  ;;  %v1068_v3 = vmul.f32 %v1046_v44, %v1036_v62  ;;  %v1096_v5 = vsel %vm890_vm11, %v1070_v59, 0.0 }
 0x3a6   :  { %v1699_v30 = vpop.eup %1698  ;;  %v1091_v6 = vadd.f32 %v1090_v63, %v1089_v61  ;;  %v1075_v7 = vsel %vm890_vm11, %v1067_v0, 0.0  ;;  %v1042_v41 = vmul.f32 %v1697_v28, %v2172_v52  ;;  %v1073_v8 = vmul.f32 %v1056_v2, %v1041_v1 }
 0x3a7   :  { %v1076_v11 = vrot.slane %v1075_v7, 4  ;;  %v1082_v42 = vsel %vm890_vm11, %v1068_v3, 0.0  ;;  %v1039_v12 = vmul.f32 %v1699_v30, %v2174_v55  ;;  %v1097_v13 = vrot.slane %v1096_v5, 4 }
 0x3a8   :  { %v1083_v45 = vrot.slane %v1082_v42, 4  ;;  %v1074_v9 = vmul.f32 %v1058_v10, %v1042_v41  ;;  %v1092_v14 = vrot.slane %v1091_v6, 2  ;;  %v1117_v15 = vsel %vm890_vm11, %v1073_v8, 0.0 }
 0x3a9   :  { %v1701_v18 = vpop.eup %1700  ;;  %v1077_v19 = vadd.f32 %v1076_v11, %v1075_v7  ;;  %v1071_v21 = vmul.f32 %v1052_v47, %v1039_v12  ;;  %v1098_v16 = vadd.f32 %v1097_v13, %v1096_v5  ;;  %v1118_v23 = vrot.slane %v1117_v15, 4  ;;  %v1235_v12 = vld [vmem:[#allocation14 + $0x10] sm:$0xff]  ;;  %v1234_v13 = vld [vmem:[#allocation14 + $0x8] sm:$0xff] }
 0x3aa   :  { %v1084_v25 = vadd.f32 %v1083_v45, %v1082_v42  ;;  %v1040_v52 = vmul.f32 %v1701_v18, %v2178_v60  ;;  %v1093_v26 = vadd.f32 %v1092_v14, %v1091_v6  ;;  %v1124_v27 = vsel %vm890_vm11, %v1074_v9, 0.0  ;;  %1293 = vmatpush1.msra.mxu1 %v1235_v12  ;;  %v1233_v45 = vld [vmem:[#allocation14] sm:$0xff]  ;;  %v1368_v9 = vld [vmem:[#allocation16 + $0xf8] sm:$0xff]  ;;  %v1351_v18 = vld [vmem:[#allocation16 + $0x70] sm:$0xff] }
 0x3ab   :  { %v1078_v29 = vrot.slane %v1077_v19, 2  ;;  %v1099_v17 = vrot.slane %v1098_v16, 2  ;;  %v1103_v55 = vsel %vm890_vm11, %v1071_v21, 0.0  ;;  %v1119_v31 = vadd.f32 %v1118_v23, %v1117_v15  ;;  %1294 = vmatprep.subr.mxu1 %v1234_v13  ;;  %v1352_v14 = vld [vmem:[#allocation16 + $0x78] sm:$0xff]  ;;  %v1367_v15 = vld [vmem:[#allocation16 + $0xf0] sm:$0xff]  ;;  %1537 = vmatprep.subr.mxu0 %v1368_v9  ;;  %v1350_v21 = vld [vmem:[#allocation16 + $0x68] sm:$0xff] }
 0x3ac   :  { %v1085_v20 = vrot.slane %v1084_v25, 2  ;;  %v1072_v32 = vmul.f32 %v1054_v51, %v1040_v52  ;;  %v1104_v33 = vrot.slane %v1103_v55, 4  ;;  %v1125_v37 = vrot.slane %v1124_v27, 4  ;;  %1295 = vmatpush1.msra.mxu1 %v1233_v45  ;;  %v1349_v23 = vld [vmem:[#allocation16 + $0x60] sm:$0xff]  ;;  %v1348_v52 = vld [vmem:[#allocation16 + $0x58] sm:$0xff] }
 0x3ad   :  { %v1079_v34 = vadd.f32 %v1078_v29, %v1077_v19  ;;  %v1100_v22 = vadd.f32 %v1099_v17, %v1098_v16  ;;  %v1120_v35 = vrot.slane %v1119_v31, 2  ;;  %v1094_v39 = vrot.slane %v1093_v26, 1  ;;  %v1366_v19 = vld [vmem:[#allocation16 + $0xe8] sm:$0xff]  ;;  %v1365_v16 = vld [vmem:[#allocation16 + $0xe0] sm:$0xff] }
 0x3ae   :  { %v1086_v38 = vadd.f32 %v1085_v20, %v1084_v25  ;;  %v1105_v40 = vadd.f32 %v1104_v33, %v1103_v55  ;;  %v1110_v36 = vsel %vm890_vm11, %v1072_v32, 0.0  ;;  %v1126_v48 = vadd.f32 %v1125_v37, %v1124_v27  ;;  %v1364_v25 = vld [vmem:[#allocation16 + $0xd8] sm:$0xff]  ;;  %v1347_v27 = vld [vmem:[#allocation16 + $0x50] sm:$0xff]  ;;  %v1362_v29 = vld [vmem:[#allocation16 + $0xc8] sm:$0xff] }
 0x3af   :  { %v1080_v60 = vrot.slane %v1079_v34, 1  ;;  %v1111_v43 = vrot.slane %v1110_v36, 4  ;;  %v1101_v46 = vrot.slane %v1100_v22, 1  ;;  %v1121_v50 = vadd.f32 %v1120_v35, %v1119_v31  ;;  %v1346_v17 = vld [vmem:[#allocation16 + $0x48] sm:$0xff]  ;;  %v1361_v55 = vld [vmem:[#allocation16 + $0xc0] sm:$0xff]  ;;  %v1360_v20 = vld [vmem:[#allocation16 + $0xb8] sm:$0xff] }
 0x3b0   :  { %v1087_v44 = vrot.slane %v1086_v38, 1  ;;  %v1106_v47 = vrot.slane %v1105_v40, 2  ;;  %v1127_v56 = vrot.slane %v1126_v48, 2  ;;  %v1095_v57 = vadd.f32 %v1094_v39, %v1093_v26  ;;  %v1363_v26 = vld [vmem:[#allocation16 + $0xd0] sm:$0xff]  ;;  %v1345_v31 = vld [vmem:[#allocation16 + $0x40] sm:$0xff]  ;;  %v1344_v32 = vld [vmem:[#allocation16 + $0x38] sm:$0xff] }
 0x3b1   :  { %v1112_v49 = vadd.f32 %v1111_v43, %v1110_v36  ;;  %v1081_v53 = vadd.f32 %v1080_v60, %v1079_v34  ;;  %v1102_v59 = vadd.f32 %v1101_v46, %v1100_v22  ;;  %v1122_v2 = vrot.slane %v1121_v50, 1  ;;  %v1359_v33 = vld [vmem:[#allocation16 + $0xb0] sm:$0xff]  ;;  %v1358_v22 = vld [vmem:[#allocation16 + $0xa8] sm:$0xff]  ;;  %v1357_v37 = vld [vmem:[#allocation16 + $0xa0] sm:$0xff] }
 0x3b2   :  { %v1088_v51 = vadd.f32 %v1087_v44, %v1086_v38  ;;  %v1107_v54 = vadd.f32 %v1106_v47, %v1105_v40  ;;  %v1128_v62 = vadd.f32 %v1127_v56, %v1126_v48  ;;  %v1343_v34 = vld [vmem:[#allocation16 + $0x30] sm:$0xff]  ;;  %v1342_v35 = vld [vmem:[#allocation16 + $0x28] sm:$0xff]  ;;  %v1341_v38 = vld [vmem:[#allocation16 + $0x20] sm:$0xff] }
 0x3b3   :  { %v1113_v58 = vrot.slane %v1112_v49, 2  ;;  %v1123_v41 = vadd.f32 %v1122_v2, %v1121_v50  ;;  %v1493_v40 = vld [vmem:[%s2234_s11] ss:$0 sm:$0xff]  ;;  %v1355_v46 = vld [vmem:[#allocation16 + $0x90] sm:$0xff]  ;;  %v1354_v48 = vld [vmem:[#allocation16 + $0x88] sm:$0xff] }
 0x3b4   :  { %v1108_v61 = vrot.slane %v1107_v54, 1  ;;  %v1154_v63 = vsel %vm359_vm2, %v1088_v51, %v1081_v53  ;;  %v1129_v30 = vrot.slane %v1128_v62, 1  ;;  %v1356_v43 = vld [vmem:[#allocation16 + $0x98] sm:$0xff]  ;;  %v1339_v47 = vld [vmem:[#allocation16 + $0x10] sm:$0xff]  ;;  %v1353_v50 = vld [vmem:[#allocation16 + $0x80] sm:$0xff] }
 0x3b5   :  { %v1114_v0 = vadd.f32 %v1113_v58, %v1112_v49  ;;  %v1155_v1 = vsel %vm361_vm3, %v1095_v57, %v1154_v63  ;;  %v1340_v44 = vld [vmem:[#allocation16 + $0x18] sm:$0xff]  ;;  %v1338_v49 = vld [vmem:[#allocation16 + $0x8] sm:$0xff]  ;;  %v1337_v53 = vld [vmem:[#allocation16] sm:$0xff] }
 0x3b6   :  { %v1109_v28 = vadd.f32 %v1108_v61, %v1107_v54  ;;  %v1156_v3 = vsel %vm363_vm4, %v1102_v59, %v1155_v1  ;;  %v1130_v8 = vadd.f32 %v1129_v30, %v1128_v62  ;;  %v1249_v51 = vld [vmem:[%s2236_s13] sm:$0x3]  ;;  %v1257_v54 = vsub.s32 1, %v2070_v4  ;;  %s1888_s13 = smov [#allocation17]  }
 0x3b7   :  { %v1115_v5 = vrot.slane %v1114_v0, 1  ;;  %v1254_v56 = vrot.slane %v1249_v51, %v2080_v24  ;;  %s1453_s23 = sshll.u32 %s1888_s13, 4  ;;  %s1454_s23 = int_to_ptr.vmem [resolvable:$true] %s1453_s23 }
 0x3b8   :  { %v1157_v6 = vsel %vm365_vm5, %v1109_v28, %v1156_v3  ;;  %v1258_v57 = vrot.slane %v1249_v51, %v1257_v54  ;;  %v1496_v28 = vld [vmem:[%s2238_s15] ss:$0 sm:$0xff]  ;;  %s1842_s6 = scalar_lea.vmem %s1454_s23, 128  ;;  %p1847_p9 = scmp.lt.s32.totalorder %s1454_s23, %s1454_s23 }
 0x3b9   :  { %v1116_v7 = vadd.f32 %v1115_v5, %v1114_v0  ;;  %p1843_p8 = scmp.ne.s32.totalorder %s1454_s23, %s1842_s6  ;;  %p1848_p10 = scmp.lt.s32.totalorder %s1842_s6, %s1842_s6 }
 0x3bb   :  { %v1158_v10 = vsel %vm367_vm6, %v1116_v7, %v1157_v6  ;;  %p1849_p11 = por %p1848_p10, %p1847_p9 }
 0x3bc   :  { %v1159_v11 = vsel %vm369_vm7, %v1123_v41, %v1158_v10 }
 0x3bd   :  { %v1160_v42 = vsel %vm371_vm8, %v1130_v8, %v1159_v11  ;;  %p1850_p12 = pnand %p1849_p11, %p1843_p8 }
 0x3be   :  { %1649 = vmatmul.mubr.msk.f32.vlgmr.msra.gmra.mxu0 %vm557_vm10, %v1160_v42 }
 0x3bf   :  { %1538 = vmatpush3.msra.mxu0 %v1352_v14 }
 0x3c0   :  { %1539 = vmatprep.subr.mxu0 %v1367_v15 }
 0x3c1   :  { %1540 = vmatpush3.msra.mxu0 %v1351_v18 }
 0x3c2   :  { %1541 = vmatprep.subr.mxu0 %v1366_v19 }
 0x3c3   :  { %1542 = vmatpush3.msra.mxu0 %v1350_v21 }
 0x3c4   :  { %1543 = vmatprep.subr.mxu0 %v1365_v16 }
 0x3c5   :  { %1544 = vmatpush3.msra.mxu0 %v1349_v23 }
 0x3c6   :  { %1545 = vmatprep.subr.mxu0 %v1364_v25 }
 0x3c7   :  { %1546 = vmatpush3.msra.mxu0 %v1348_v52 }
 0x3c8   :  { %1547 = vmatprep.subr.mxu0 %v1363_v26 }
 0x3c9   :  { %1548 = vmatpush3.msra.mxu0 %v1347_v27 }
 0x3ca   :  { %1549 = vmatprep.subr.mxu0 %v1362_v29 }
 0x3cb   :  { %1550 = vmatpush3.msra.mxu0 %v1346_v17 }
 0x3cc   :  { %1551 = vmatprep.subr.mxu0 %v1361_v55 }
 0x3cd   :  { %1552 = vmatpush3.msra.mxu0 %v1345_v31 }
 0x3ce   :  { %1553 = vmatprep.subr.mxu0 %v1360_v20 }
 0x3cf   :  { %1554 = vmatpush3.msra.mxu0 %v1344_v32 }
 0x3d0   :  { %1555 = vmatprep.subr.mxu0 %v1359_v33 }
 0x3d1   :  { %1556 = vmatpush3.msra.mxu0 %v1343_v34 }
 0x3d2   :  { %1557 = vmatprep.subr.mxu0 %v1358_v22 }
 0x3d3   :  { %1558 = vmatpush3.msra.mxu0 %v1342_v35 }
 0x3d4   :  { %1559 = vmatprep.subr.mxu0 %v1357_v37 }
 0x3d5   :  { %1560 = vmatpush3.msra.mxu0 %v1341_v38 }
 0x3d6   :  { %1561 = vmatprep.subr.mxu0 %v1356_v43 }
 0x3d7   :  { %1562 = vmatpush3.msra.mxu0 %v1340_v44 }
 0x3d8   :  { %1563 = vmatprep.subr.mxu0 %v1355_v46 }
 0x3d9   :  { %1564 = vmatpush3.msra.mxu0 %v1339_v47 }
 0x3da   :  { %1565 = vmatprep.subr.mxu0 %v1354_v48 }
 0x3db   :  { %1566 = vmatpush3.msra.mxu0 %v1338_v49 }
 0x3dc   :  { %1567 = vmatprep.subr.mxu0 %v1353_v50 }
 0x3dd   :  { %1568 = vmatpush3.msra.mxu0 %v1337_v53 }
 0x47e   :  { %v1229_v36 = vpop.f32.mrf.mxu0 }
 0x47f   :  { %v1230_v60 = vadd.f32 %v1493_v40, %v1229_v36 }
 0x480   :  { %v1650_v39 = vpop.f32.mrf.mxu0 }
 0x481   :  { %1495 = vmatmul.mubr.msk.f32.vlgmr.msra.gmra.mxu1 %vm557_vm10, %v1230_v60 }
 0x541   :  { %v1330_v58 = vpop.f32.mrf.mxu1 }
 0x542   :  { %v1331_v59 = vadd.f32 %v1330_v58, %v1254_v56 }
 0x543   :  { %v1332_v61 = vpop.f32.mrf.mxu1 }
 0x544   :  { %v1333_v62 = vadd.f32 %v1332_v61, %v1258_v57  ;;  %v1335_v0 = vmax.f32 %v1331_v59, 0.0 }
 0x546   :  { %v1336_v63 = vmax.f32 %v1333_v62, 0.0 }
 0x548   :  { %1440 = vmatprep.mubr.f32.mxu0 %v1336_v63 }
 0x549   :  { %1441 = vmatmul.mubr.f32.vlgmr.msra.gmra.mxu0 %v1335_v0 }
 0x609   :  { %v1569_v1 = vpop.f32.mrf.mxu0 }
 0x60b   :  { %v1570_v2 = vpop.f32.mrf.mxu0 }
 0x60c   :  { %v1571_v4 = vadd.f32 %v1570_v2, %v1569_v1 }
 0x60e   :  { %v1443_v3 = vadd.f32 %v1571_v4, %v1496_v28 }
 0x610   :  { %1446 = vst [vmem:[#allocation17] sm:$0xff] %v1443_v3 }
 0x611   :  { %1853 = shalt.err (!%p1850_p12)
}
 0x612   :  { %1456 = dma.vmem_to_hbm [thread:$0]  %s1454_s23, 128, %s2239_s16, [#allocation7]  }
 0x613   :  { %1870 = dma.done.wait [#allocation7], 128  }
 0x614   :  { %1871 = vsyncadd [#allocation7], 4294967168 }
 0x615   :  { %1460 = vsyncpa [#allocation6], 1 }
 0x616   :  { %1461 = vsyncpa [#allocation9], 1 }
 0x617   :  { %1462 = vsyncpa [#allocation12], 1 }
 0x618   :  { %1463 = vsyncpa [#allocation15], 1 }
 0x619   :  { %1464 = vsyncpa [#allocation7], 1 }

</bundles_post_ra>
